<compile_context>
chip_gen: v7x
topology: tpu7x:2x2x1
jax: 0.10.0
libtpu: 0.0.40
codegen_flags: <defaults>
</compile_context>

<pallas_src>
import functools

import jax
import jax.numpy as jnp
from jax.experimental import pallas as pl
from jax.experimental.pallas import tpu as pltpu

_LANE_PAD = 128  # lane-dense width for the padded logits slab


# ----------------------------------------------------------------------------
# Fused kernel: one grid step == one batch block, full forward pass.
# ----------------------------------------------------------------------------
def _fused_transformer_kernel(tok_ref,                         # SMEM (B_pad, S) int32
                              emb_ref, possum_ref,
                              wv_ref, bv_ref, w1_ref, b1_ref, w2_ref, b2_ref,
                              fw1s_ref, fb1_ref, fw2_ref, fb2_ref,
                              fw3_ref, fb3_ref,
                              out_ref,                          # (Bblk, 128) f32
                              xsum_scr,                         # VMEM (Bblk, E)
                              *, num_layers, seq_len, block_b):
    S = seq_len
    b0 = pl.program_id(0) * block_b

    # ---- embedding: xsum[b] = sum_s embed[tok[b,s]] + sum_s pos[s] ----------
    # Scalar-prefetch gather (SMEM token ids -> dynamic VMEM row loads),
    # replacing the one-hot matmul of the previous version.
    for bb in range(block_b):
        acc = possum_ref[...]                                   # (1, E)
        for s in range(S):
            t = tok_ref[b0 + bb, s]
            acc = acc + emb_ref[pl.ds(t, 1), :]                 # (1, E)
        xsum_scr[pl.ds(bb, 1), :] = acc

    ssum = xsum_scr[...]                                        # (Bblk, E): sum over seq

    # ---- encoder stack (rank-1: every activation row is identical) ---------
    row = ssum
    for l in range(num_layers):
        # Attention(x,x,x): att row == (sum_s x) @ Wv_blockdiag + S * bv_tiled
        vrow = (jnp.dot(ssum, wv_ref[l], preferred_element_type=jnp.float32)
                + float(S) * bv_ref[l])                         # (Bblk, E)
        # Encoder FFN: Linear -> ReLU -> Linear (no residual in the reference)
        h = jnp.maximum(
            jnp.dot(vrow, w1_ref[l], preferred_element_type=jnp.float32) + b1_ref[l],
            0.0)                                                # (Bblk, 4E)
        row = (jnp.dot(h, w2_ref[l], preferred_element_type=jnp.float32)
               + b2_ref[l])                                     # (Bblk, E)
        ssum = float(S) * row                                   # next layer's seq-sum

    # ---- final classifier on flat = x.reshape(B, S*E) (identical rows) -----
    # flat @ W1f == row @ fw1_sum  (fw1_sum precomputed in pack_params)
    h1 = jnp.maximum(
        jnp.dot(row, fw1s_ref[...], preferred_element_type=jnp.float32) + fb1_ref[...],
        0.0)                                                    # (Bblk, 1200)
    h2 = jnp.maximum(
        jnp.dot(h1, fw2_ref[...], preferred_element_type=jnp.float32) + fb2_ref[...],
        0.0)                                                    # (Bblk, 128)
    logits = (jnp.dot(h2, fw3_ref[...], preferred_element_type=jnp.float32)
              + fb3_ref[...])                                   # (Bblk, 128) lane-padded
    out_ref[...] = logits.astype(out_ref.dtype)


# ----------------------------------------------------------------------------
# Wrapper: single pallas_call for the whole forward.
# ----------------------------------------------------------------------------
@functools.partial(jax.jit, static_argnames=("out_dim", "block_b"))
def transformer_forward(tokens, kp, *, out_dim=2, block_b=None):
    B, S = tokens.shape
    E = kp["embed"].shape[1]
    L = kp["wv"].shape[0]
    OPAD = kp["fw3"].shape[1]

    if block_b is None:
        # Whole batch in one grid step (best on v5e/v6e).  On v7x with a large
        # batch, pass block_b = cdiv(B, 2) to split across the two TensorCores.
        block_b = B
    num_blocks = pl.cdiv(B, block_b)
    b_pad = num_blocks * block_b

    tok = tokens.astype(jnp.int32)
    if b_pad != B:
        tok = jnp.pad(tok, ((0, b_pad - B), (0, 0)))

    kernel = functools.partial(_fused_transformer_kernel,
                               num_layers=L, seq_len=S, block_b=block_b)

    def full(arr):
        zeros = (0,) * arr.ndim
        return pl.BlockSpec(arr.shape, lambda i, tok_ref, z=zeros: z)  # VMEM-resident

    grid_spec = pltpu.PrefetchScalarGridSpec(
        num_scalar_prefetch=1,              # token ids live in SMEM
        grid=(num_blocks,),
        in_specs=[
            full(kp["embed"]), full(kp["possum"]),
            full(kp["wv"]), full(kp["bv"]),
            full(kp["w1"]), full(kp["b1"]),
            full(kp["w2"]), full(kp["b2"]),
            full(kp["fw1s"]), full(kp["fb1"]),
            full(kp["fw2"]), full(kp["fb2"]),
            full(kp["fw3"]), full(kp["fb3"]),
        ],
        out_specs=pl.BlockSpec((block_b, OPAD), lambda i, tok_ref: (i, 0)),
        scratch_shapes=[pltpu.VMEM((block_b, E), jnp.float32)],
    )

    out = pl.pallas_call(
        kernel,
        out_shape=jax.ShapeDtypeStruct((b_pad, OPAD), jnp.float32),
        grid_spec=grid_spec,
        compiler_params=pltpu.CompilerParams(
            dimension_semantics=("parallel",)),
    )(tok, kp["embed"], kp["possum"],
      kp["wv"], kp["bv"], kp["w1"], kp["b1"], kp["w2"], kp["b2"],
      kp["fw1s"], kp["fb1"], kp["fw2"], kp["fb2"], kp["fw3"], kp["fb3"])

    return out[:B, :out_dim]


# ----------------------------------------------------------------------------
# Parameter init (shape-faithful to the nn.Module __init__) + kernel packing
# ----------------------------------------------------------------------------
def _linear(key, in_f, out_f, scale=0.05):
    kw, kb = jax.random.split(key)
    w_t = scale * jax.random.normal(kw, (in_f, out_f), jnp.float32)   # torch_W.T
    b = scale * jax.random.normal(kb, (out_f,), jnp.float32)
    return w_t, b


def init_params(key, embed_dim, n_heads, num_layers, expansion, vocab_size, seq_len):
    D = embed_dim // n_heads
    keys = jax.random.split(key, 3 + num_layers)
    params = {
        "embed": 0.05 * jax.random.normal(keys[0], (vocab_size, embed_dim), jnp.float32),
        "pos":   0.05 * jax.random.normal(keys[1], (seq_len, embed_dim), jnp.float32),
        "layers": [],
    }
    for li in range(num_layers):
        lk = jax.random.split(keys[2 + li], 5)
        # key/query projections exist in the module but are dead code in its
        # forward (the 'bqhk,bvhe->bqhe' einsum makes their output irrelevant).
        wk_t, bk = _linear(lk[0], D, D)
        wq_t, bq = _linear(lk[1], D, D)
        wv_t, bv = _linear(lk[2], D, D)
        w1_t, b1 = _linear(lk[3], embed_dim, embed_dim * expansion)
        w2_t, b2 = _linear(lk[4], embed_dim * expansion, embed_dim)
        params["layers"].append(dict(wk_t=wk_t, bk=bk, wq_t=wq_t, bq=bq,
                                     wv_t=wv_t, bv=bv,
                                     w1_t=w1_t, b1=b1, w2_t=w2_t, b2=b2))
    # Model(): Linear(S*E, 1200) -> ReLU -> Linear(1200, 128) -> ReLU -> Linear(128, 2)
    fk = jax.random.split(keys[2 + num_layers], 3)
    w1_t, b1 = _linear(fk[0], seq_len * embed_dim, 1200)
    w2_t, b2 = _linear(fk[1], 1200, 128)
    w3_t, b3 = _linear(fk[2], 128, 2)
    params["final"] = dict(w1_t=w1_t, b1=b1, w2_t=w2_t, b2=b2, w3_t=w3_t, b3=b3)
    return params


def pack_params(params, n_heads, seq_len):
    """One-time packing of module params into kernel-ready VMEM slabs."""
    E = params["embed"].shape[1]
    H = n_heads
    eye = jnp.eye(H, dtype=jnp.float32)
    # per-head (D,D) value weight -> block-diagonal (E,E) (head-major layout,
    # matching x.reshape(S, H, D)); bias tiled over heads.
    wv = jnp.stack([jnp.kron(eye, l["wv_t"]) for l in params["layers"]])      # (L,E,E)
    bv = jnp.stack([jnp.tile(l["bv"], H)[None, :] for l in params["layers"]]) # (L,1,E)
    w1 = jnp.stack([l["w1_t"] for l in params["layers"]])                     # (L,E,4E)
    b1 = jnp.stack([l["b1"][None, :] for l in params["layers"]])              # (L,1,4E)
    w2 = jnp.stack([l["w2_t"] for l in params["layers"]])                     # (L,4E,E)
    b2 = jnp.stack([l["b2"][None, :] for l in params["layers"]])              # (L,1,E)

    fin = params["final"]
    hid1 = fin["w1_t"].shape[1]
    # classifier acts on identical rows -> sum the per-position blocks of W1f
    fw1s = fin["w1_t"].reshape(seq_len, E, hid1).sum(axis=0)                  # (E,1200)
    # lane-pad the tiny final projection so the kernel's output slab is 128-wide
    out_dim = fin["w3_t"].shape[1]
    fw3 = jnp.zeros((fin["w3_t"].shape[0], _LANE_PAD), jnp.float32)
    fw3 = fw3.at[:, :out_dim].set(fin["w3_t"])                                # (128,128)
    fb3 = jnp.zeros((1, _LANE_PAD), jnp.float32).at[:, :out_dim].set(fin["b3"])

    possum = params["pos"].sum(axis=0, keepdims=True)                         # (1,E)
    return dict(embed=params["embed"], possum=possum,
                wv=wv, bv=bv, w1=w1, b1=b1, w2=w2, b2=b2,
                fw1s=fw1s, fb1=fin["b1"][None, :],
                fw2=fin["w2_t"], fb2=fin["b2"][None, :],
                fw3=fw3, fb3=fb3)


if __name__ == "__main__":
    # small shapes consistent with the module
    batch, seq_len = 2, 8
    embed_dim, n_heads, num_layers, expansion, vocab_size = 20, 5, 2, 4, 50

    root = jax.random.PRNGKey(0)
    k_tok, k_par = jax.random.split(root)
    tokens = jax.random.randint(k_tok, (batch, seq_len), 0, vocab_size, dtype=jnp.int32)
    params = init_params(k_par, embed_dim, n_heads, num_layers, expansion,
                         vocab_size, seq_len)
    kp = pack_params(params, n_heads, seq_len)

    out = transformer_forward(tokens, kp, out_dim=2)
    out = jax.block_until_ready(out)
    assert out.shape == (batch, 2) and out.dtype == jnp.float32
    print("KERNEL_OK")
</pallas_src>

<mosaic_0001>
module attributes {stable_mosaic.version = 11 : i64} {
  func.func @_fused_transformer_kernel(%arg0: i32, %arg1: memref<2x8xi32, #tpu.memory_space<smem>>, %arg2: memref<50x20xf32, #tpu.memory_space<vmem>>, %arg3: memref<1x20xf32, #tpu.memory_space<vmem>>, %arg4: memref<2x20x20xf32, #tpu.memory_space<vmem>>, %arg5: memref<2x1x20xf32, #tpu.memory_space<vmem>>, %arg6: memref<2x20x80xf32, #tpu.memory_space<vmem>>, %arg7: memref<2x1x80xf32, #tpu.memory_space<vmem>>, %arg8: memref<2x80x20xf32, #tpu.memory_space<vmem>>, %arg9: memref<2x1x20xf32, #tpu.memory_space<vmem>>, %arg10: memref<20x1200xf32, #tpu.memory_space<vmem>>, %arg11: memref<1x1200xf32, #tpu.memory_space<vmem>>, %arg12: memref<1200x128xf32, #tpu.memory_space<vmem>>, %arg13: memref<1x128xf32, #tpu.memory_space<vmem>>, %arg14: memref<128x128xf32, #tpu.memory_space<vmem>>, %arg15: memref<1x128xf32, #tpu.memory_space<vmem>>, %arg16: memref<2x128xf32, #tpu.memory_space<vmem>>, %arg17: memref<2x20xf32, #tpu.memory_space<vmem>>) attributes {dimension_semantics = [#tpu.dimension_semantics<parallel>], iteration_bounds = array<i64: 1>, scalar_prefetch = 1 : i64, scratch_operands = 1 : i64, tpu.core_type = #tpu.core_type<tc>, window_params = [{pipeline_mode = #tpu.pipeline_mode<synchronous>, transform_indices = @transform_0, window_bounds = array<i64: 50, 20>}, {pipeline_mode = #tpu.pipeline_mode<synchronous>, transform_indices = @transform_1, window_bounds = array<i64: 1, 20>}, {pipeline_mode = #tpu.pipeline_mode<synchronous>, transform_indices = @transform_2, window_bounds = array<i64: 2, 20, 20>}, {pipeline_mode = #tpu.pipeline_mode<synchronous>, transform_indices = @transform_3, window_bounds = array<i64: 2, 1, 20>}, {pipeline_mode = #tpu.pipeline_mode<synchronous>, transform_indices = @transform_4, window_bounds = array<i64: 2, 20, 80>}, {pipeline_mode = #tpu.pipeline_mode<synchronous>, transform_indices = @transform_5, window_bounds = array<i64: 2, 1, 80>}, {pipeline_mode = #tpu.pipeline_mode<synchronous>, transform_indices = @transform_6, window_bounds = array<i64: 2, 80, 20>}, {pipeline_mode = #tpu.pipeline_mode<synchronous>, transform_indices = @transform_7, window_bounds = array<i64: 2, 1, 20>}, {pipeline_mode = #tpu.pipeline_mode<synchronous>, transform_indices = @transform_8, window_bounds = array<i64: 20, 1200>}, {pipeline_mode = #tpu.pipeline_mode<synchronous>, transform_indices = @transform_9, window_bounds = array<i64: 1, 1200>}, {pipeline_mode = #tpu.pipeline_mode<synchronous>, transform_indices = @transform_10, window_bounds = array<i64: 1200, 128>}, {pipeline_mode = #tpu.pipeline_mode<synchronous>, transform_indices = @transform_11, window_bounds = array<i64: 1, 128>}, {pipeline_mode = #tpu.pipeline_mode<synchronous>, transform_indices = @transform_12, window_bounds = array<i64: 128, 128>}, {pipeline_mode = #tpu.pipeline_mode<synchronous>, transform_indices = @transform_13, window_bounds = array<i64: 1, 128>}, {transform_indices = @transform_14, window_bounds = array<i64: 2, 128>}]} {
    %c2_i32 = arith.constant 2 : i32
    %0 = arith.muli %arg0, %c2_i32 : i32
    %c0 = arith.constant 0 : index
    %c0_0 = arith.constant 0 : index
    %1 = vector.load %arg3[%c0, %c0_0] : memref<1x20xf32, #tpu.memory_space<vmem>>, vector<1x20xf32>
    %c0_i32 = arith.constant 0 : i32
    %2 = arith.addi %0, %c0_i32 : i32
    %3 = arith.index_cast %2 : i32 to index
    %c0_1 = arith.constant 0 : index
    %4 = memref.load %arg1[%3, %c0_1] : memref<2x8xi32, #tpu.memory_space<smem>>
    %5 = arith.index_cast %4 : i32 to index
    %c0_2 = arith.constant 0 : index
    %6 = vector.load %arg2[%5, %c0_2] : memref<50x20xf32, #tpu.memory_space<vmem>>, vector<1x20xf32>
    %7 = arith.addf %1, %6 : vector<1x20xf32>
    %c0_i32_3 = arith.constant 0 : i32
    %8 = arith.addi %0, %c0_i32_3 : i32
    %9 = arith.index_cast %8 : i32 to index
    %c1 = arith.constant 1 : index
    %10 = memref.load %arg1[%9, %c1] : memref<2x8xi32, #tpu.memory_space<smem>>
    %11 = arith.index_cast %10 : i32 to index
    %c0_4 = arith.constant 0 : index
    %12 = vector.load %arg2[%11, %c0_4] : memref<50x20xf32, #tpu.memory_space<vmem>>, vector<1x20xf32>
    %13 = arith.addf %7, %12 : vector<1x20xf32>
    %c0_i32_5 = arith.constant 0 : i32
    %14 = arith.addi %0, %c0_i32_5 : i32
    %15 = arith.index_cast %14 : i32 to index
    %c2 = arith.constant 2 : index
    %16 = memref.load %arg1[%15, %c2] : memref<2x8xi32, #tpu.memory_space<smem>>
    %17 = arith.index_cast %16 : i32 to index
    %c0_6 = arith.constant 0 : index
    %18 = vector.load %arg2[%17, %c0_6] : memref<50x20xf32, #tpu.memory_space<vmem>>, vector<1x20xf32>
    %19 = arith.addf %13, %18 : vector<1x20xf32>
    %c0_i32_7 = arith.constant 0 : i32
    %20 = arith.addi %0, %c0_i32_7 : i32
    %21 = arith.index_cast %20 : i32 to index
    %c3 = arith.constant 3 : index
    %22 = memref.load %arg1[%21, %c3] : memref<2x8xi32, #tpu.memory_space<smem>>
    %23 = arith.index_cast %22 : i32 to index
    %c0_8 = arith.constant 0 : index
    %24 = vector.load %arg2[%23, %c0_8] : memref<50x20xf32, #tpu.memory_space<vmem>>, vector<1x20xf32>
    %25 = arith.addf %19, %24 : vector<1x20xf32>
    %c0_i32_9 = arith.constant 0 : i32
    %26 = arith.addi %0, %c0_i32_9 : i32
    %27 = arith.index_cast %26 : i32 to index
    %c4 = arith.constant 4 : index
    %28 = memref.load %arg1[%27, %c4] : memref<2x8xi32, #tpu.memory_space<smem>>
    %29 = arith.index_cast %28 : i32 to index
    %c0_10 = arith.constant 0 : index
    %30 = vector.load %arg2[%29, %c0_10] : memref<50x20xf32, #tpu.memory_space<vmem>>, vector<1x20xf32>
    %31 = arith.addf %25, %30 : vector<1x20xf32>
    %c0_i32_11 = arith.constant 0 : i32
    %32 = arith.addi %0, %c0_i32_11 : i32
    %33 = arith.index_cast %32 : i32 to index
    %c5 = arith.constant 5 : index
    %34 = memref.load %arg1[%33, %c5] : memref<2x8xi32, #tpu.memory_space<smem>>
    %35 = arith.index_cast %34 : i32 to index
    %c0_12 = arith.constant 0 : index
    %36 = vector.load %arg2[%35, %c0_12] : memref<50x20xf32, #tpu.memory_space<vmem>>, vector<1x20xf32>
    %37 = arith.addf %31, %36 : vector<1x20xf32>
    %c0_i32_13 = arith.constant 0 : i32
    %38 = arith.addi %0, %c0_i32_13 : i32
    %39 = arith.index_cast %38 : i32 to index
    %c6 = arith.constant 6 : index
    %40 = memref.load %arg1[%39, %c6] : memref<2x8xi32, #tpu.memory_space<smem>>
    %41 = arith.index_cast %40 : i32 to index
    %c0_14 = arith.constant 0 : index
    %42 = vector.load %arg2[%41, %c0_14] : memref<50x20xf32, #tpu.memory_space<vmem>>, vector<1x20xf32>
    %43 = arith.addf %37, %42 : vector<1x20xf32>
    %c0_i32_15 = arith.constant 0 : i32
    %44 = arith.addi %0, %c0_i32_15 : i32
    %45 = arith.index_cast %44 : i32 to index
    %c7 = arith.constant 7 : index
    %46 = memref.load %arg1[%45, %c7] : memref<2x8xi32, #tpu.memory_space<smem>>
    %47 = arith.index_cast %46 : i32 to index
    %c0_16 = arith.constant 0 : index
    %48 = vector.load %arg2[%47, %c0_16] : memref<50x20xf32, #tpu.memory_space<vmem>>, vector<1x20xf32>
    %49 = arith.addf %43, %48 : vector<1x20xf32>
    %c0_17 = arith.constant 0 : index
    %c0_18 = arith.constant 0 : index
    %50 = vector.load %arg17[%c0_17, %c0_18] : memref<2x20xf32, #tpu.memory_space<vmem>>, vector<1x20xf32>
    tpu.vector_store %arg17[%c0_17, %c0_18], %49 {strides = array<i32>} : memref<2x20xf32, #tpu.memory_space<vmem>>, vector<1x20xf32>,
    %c0_19 = arith.constant 0 : index
    %c0_20 = arith.constant 0 : index
    %51 = vector.load %arg3[%c0_19, %c0_20] : memref<1x20xf32, #tpu.memory_space<vmem>>, vector<1x20xf32>
    %c1_i32 = arith.constant 1 : i32
    %52 = arith.addi %0, %c1_i32 : i32
    %53 = arith.index_cast %52 : i32 to index
    %c0_21 = arith.constant 0 : index
    %54 = memref.load %arg1[%53, %c0_21] : memref<2x8xi32, #tpu.memory_space<smem>>
    %55 = arith.index_cast %54 : i32 to index
    %c0_22 = arith.constant 0 : index
    %56 = vector.load %arg2[%55, %c0_22] : memref<50x20xf32, #tpu.memory_space<vmem>>, vector<1x20xf32>
    %57 = arith.addf %51, %56 : vector<1x20xf32>
    %c1_i32_23 = arith.constant 1 : i32
    %58 = arith.addi %0, %c1_i32_23 : i32
    %59 = arith.index_cast %58 : i32 to index
    %c1_24 = arith.constant 1 : index
    %60 = memref.load %arg1[%59, %c1_24] : memref<2x8xi32, #tpu.memory_space<smem>>
    %61 = arith.index_cast %60 : i32 to index
    %c0_25 = arith.constant 0 : index
    %62 = vector.load %arg2[%61, %c0_25] : memref<50x20xf32, #tpu.memory_space<vmem>>, vector<1x20xf32>
    %63 = arith.addf %57, %62 : vector<1x20xf32>
    %c1_i32_26 = arith.constant 1 : i32
    %64 = arith.addi %0, %c1_i32_26 : i32
    %65 = arith.index_cast %64 : i32 to index
    %c2_27 = arith.constant 2 : index
    %66 = memref.load %arg1[%65, %c2_27] : memref<2x8xi32, #tpu.memory_space<smem>>
    %67 = arith.index_cast %66 : i32 to index
    %c0_28 = arith.constant 0 : index
    %68 = vector.load %arg2[%67, %c0_28] : memref<50x20xf32, #tpu.memory_space<vmem>>, vector<1x20xf32>
    %69 = arith.addf %63, %68 : vector<1x20xf32>
    %c1_i32_29 = arith.constant 1 : i32
    %70 = arith.addi %0, %c1_i32_29 : i32
    %71 = arith.index_cast %70 : i32 to index
    %c3_30 = arith.constant 3 : index
    %72 = memref.load %arg1[%71, %c3_30] : memref<2x8xi32, #tpu.memory_space<smem>>
    %73 = arith.index_cast %72 : i32 to index
    %c0_31 = arith.constant 0 : index
    %74 = vector.load %arg2[%73, %c0_31] : memref<50x20xf32, #tpu.memory_space<vmem>>, vector<1x20xf32>
    %75 = arith.addf %69, %74 : vector<1x20xf32>
    %c1_i32_32 = arith.constant 1 : i32
    %76 = arith.addi %0, %c1_i32_32 : i32
    %77 = arith.index_cast %76 : i32 to index
    %c4_33 = arith.constant 4 : index
    %78 = memref.load %arg1[%77, %c4_33] : memref<2x8xi32, #tpu.memory_space<smem>>
    %79 = arith.index_cast %78 : i32 to index
    %c0_34 = arith.constant 0 : index
    %80 = vector.load %arg2[%79, %c0_34] : memref<50x20xf32, #tpu.memory_space<vmem>>, vector<1x20xf32>
    %81 = arith.addf %75, %80 : vector<1x20xf32>
    %c1_i32_35 = arith.constant 1 : i32
    %82 = arith.addi %0, %c1_i32_35 : i32
    %83 = arith.index_cast %82 : i32 to index
    %c5_36 = arith.constant 5 : index
    %84 = memref.load %arg1[%83, %c5_36] : memref<2x8xi32, #tpu.memory_space<smem>>
    %85 = arith.index_cast %84 : i32 to index
    %c0_37 = arith.constant 0 : index
    %86 = vector.load %arg2[%85, %c0_37] : memref<50x20xf32, #tpu.memory_space<vmem>>, vector<1x20xf32>
    %87 = arith.addf %81, %86 : vector<1x20xf32>
    %c1_i32_38 = arith.constant 1 : i32
    %88 = arith.addi %0, %c1_i32_38 : i32
    %89 = arith.index_cast %88 : i32 to index
    %c6_39 = arith.constant 6 : index
    %90 = memref.load %arg1[%89, %c6_39] : memref<2x8xi32, #tpu.memory_space<smem>>
    %91 = arith.index_cast %90 : i32 to index
    %c0_40 = arith.constant 0 : index
    %92 = vector.load %arg2[%91, %c0_40] : memref<50x20xf32, #tpu.memory_space<vmem>>, vector<1x20xf32>
    %93 = arith.addf %87, %92 : vector<1x20xf32>
    %c1_i32_41 = arith.constant 1 : i32
    %94 = arith.addi %0, %c1_i32_41 : i32
    %95 = arith.index_cast %94 : i32 to index
    %c7_42 = arith.constant 7 : index
    %96 = memref.load %arg1[%95, %c7_42] : memref<2x8xi32, #tpu.memory_space<smem>>
    %97 = arith.index_cast %96 : i32 to index
    %c0_43 = arith.constant 0 : index
    %98 = vector.load %arg2[%97, %c0_43] : memref<50x20xf32, #tpu.memory_space<vmem>>, vector<1x20xf32>
    %99 = arith.addf %93, %98 : vector<1x20xf32>
    %c1_44 = arith.constant 1 : index
    %c0_45 = arith.constant 0 : index
    %100 = vector.load %arg17[%c1_44, %c0_45] : memref<2x20xf32, #tpu.memory_space<vmem>>, vector<1x20xf32>
    tpu.vector_store %arg17[%c1_44, %c0_45], %99 {strides = array<i32>} : memref<2x20xf32, #tpu.memory_space<vmem>>, vector<1x20xf32>,
    %c0_46 = arith.constant 0 : index
    %c0_47 = arith.constant 0 : index
    %101 = vector.load %arg17[%c0_46, %c0_47] : memref<2x20xf32, #tpu.memory_space<vmem>>, vector<2x20xf32>
    %c0_48 = arith.constant 0 : index
    %c0_49 = arith.constant 0 : index
    %c0_50 = arith.constant 0 : index
    %102 = vector.load %arg4[%c0_48, %c0_49, %c0_50] : memref<2x20x20xf32, #tpu.memory_space<vmem>>, vector<1x20x20xf32>
    %103 = vector.shape_cast %102 : vector<1x20x20xf32> to vector<20x20xf32>
    %cst = arith.constant dense<0.000000e+00> : vector<2x20xf32>
    %104 = tpu.matmul %101, %103, %cst {dimension_numbers = #tpu.dot_dimension_numbers<[1], [0], [0], [1], [0, 0, 1, 1], [], []>} : vector<2x20xf32>, vector<20x20xf32>, vector<2x20xf32> -> vector<2x20xf32>
    %c0_51 = arith.constant 0 : index
    %c0_52 = arith.constant 0 : index
    %c0_53 = arith.constant 0 : index
    %105 = vector.load %arg5[%c0_51, %c0_52, %c0_53] : memref<2x1x20xf32, #tpu.memory_space<vmem>>, vector<1x1x20xf32>
    %106 = vector.shape_cast %105 : vector<1x1x20xf32> to vector<1x20xf32>
    %cst_54 = arith.constant 8.000000e+00 : f32
    %107 = vector.broadcast %cst_54 : f32 to vector<1x20xf32>
    %108 = arith.mulf %107, %106 : vector<1x20xf32>
    %109 = vector.broadcast %108 : vector<1x20xf32> to vector<2x20xf32>
    %110 = arith.addf %104, %109 : vector<2x20xf32>
    %c0_55 = arith.constant 0 : index
    %c0_56 = arith.constant 0 : index
    %c0_57 = arith.constant 0 : index
    %111 = vector.load %arg6[%c0_55, %c0_56, %c0_57] : memref<2x20x80xf32, #tpu.memory_space<vmem>>, vector<1x20x80xf32>
    %112 = vector.shape_cast %111 : vector<1x20x80xf32> to vector<20x80xf32>
    %cst_58 = arith.constant dense<0.000000e+00> : vector<2x80xf32>
    %113 = tpu.matmul %110, %112, %cst_58 {dimension_numbers = #tpu.dot_dimension_numbers<[1], [0], [0], [1], [0, 0, 1, 1], [], []>} : vector<2x20xf32>, vector<20x80xf32>, vector<2x80xf32> -> vector<2x80xf32>
    %c0_59 = arith.constant 0 : index
    %c0_60 = arith.constant 0 : index
    %c0_61 = arith.constant 0 : index
    %114 = vector.load %arg7[%c0_59, %c0_60, %c0_61] : memref<2x1x80xf32, #tpu.memory_space<vmem>>, vector<1x1x80xf32>
    %115 = vector.shape_cast %114 : vector<1x1x80xf32> to vector<1x80xf32>
    %116 = vector.broadcast %115 : vector<1x80xf32> to vector<2x80xf32>
    %117 = arith.addf %113, %116 : vector<2x80xf32>
    %cst_62 = arith.constant 0.000000e+00 : f32
    %118 = vector.broadcast %cst_62 : f32 to vector<2x80xf32>
    %119 = arith.maximumf %117, %118 : vector<2x80xf32>
    %c0_63 = arith.constant 0 : index
    %c0_64 = arith.constant 0 : index
    %c0_65 = arith.constant 0 : index
    %120 = vector.load %arg8[%c0_63, %c0_64, %c0_65] : memref<2x80x20xf32, #tpu.memory_space<vmem>>, vector<1x80x20xf32>
    %121 = vector.shape_cast %120 : vector<1x80x20xf32> to vector<80x20xf32>
    %cst_66 = arith.constant dense<0.000000e+00> : vector<2x20xf32>
    %122 = tpu.matmul %119, %121, %cst_66 {dimension_numbers = #tpu.dot_dimension_numbers<[1], [0], [0], [1], [0, 0, 1, 1], [], []>} : vector<2x80xf32>, vector<80x20xf32>, vector<2x20xf32> -> vector<2x20xf32>
    %c0_67 = arith.constant 0 : index
    %c0_68 = arith.constant 0 : index
    %c0_69 = arith.constant 0 : index
    %123 = vector.load %arg9[%c0_67, %c0_68, %c0_69] : memref<2x1x20xf32, #tpu.memory_space<vmem>>, vector<1x1x20xf32>
    %124 = vector.shape_cast %123 : vector<1x1x20xf32> to vector<1x20xf32>
    %125 = vector.broadcast %124 : vector<1x20xf32> to vector<2x20xf32>
    %126 = arith.addf %122, %125 : vector<2x20xf32>
    %cst_70 = arith.constant 8.000000e+00 : f32
    %127 = vector.broadcast %cst_70 : f32 to vector<2x20xf32>
    %128 = arith.mulf %127, %126 : vector<2x20xf32>
    %c1_71 = arith.constant 1 : index
    %c0_72 = arith.constant 0 : index
    %c0_73 = arith.constant 0 : index
    %129 = vector.load %arg4[%c1_71, %c0_72, %c0_73] : memref<2x20x20xf32, #tpu.memory_space<vmem>>, vector<1x20x20xf32>
    %130 = vector.shape_cast %129 : vector<1x20x20xf32> to vector<20x20xf32>
    %cst_74 = arith.constant dense<0.000000e+00> : vector<2x20xf32>
    %131 = tpu.matmul %128, %130, %cst_74 {dimension_numbers = #tpu.dot_dimension_numbers<[1], [0], [0], [1], [0, 0, 1, 1], [], []>} : vector<2x20xf32>, vector<20x20xf32>, vector<2x20xf32> -> vector<2x20xf32>
    %c1_75 = arith.constant 1 : index
    %c0_76 = arith.constant 0 : index
    %c0_77 = arith.constant 0 : index
    %132 = vector.load %arg5[%c1_75, %c0_76, %c0_77] : memref<2x1x20xf32, #tpu.memory_space<vmem>>, vector<1x1x20xf32>
    %133 = vector.shape_cast %132 : vector<1x1x20xf32> to vector<1x20xf32>
    %cst_78 = arith.constant 8.000000e+00 : f32
    %134 = vector.broadcast %cst_78 : f32 to vector<1x20xf32>
    %135 = arith.mulf %134, %133 : vector<1x20xf32>
    %136 = vector.broadcast %135 : vector<1x20xf32> to vector<2x20xf32>
    %137 = arith.addf %131, %136 : vector<2x20xf32>
    %c1_79 = arith.constant 1 : index
    %c0_80 = arith.constant 0 : index
    %c0_81 = arith.constant 0 : index
    %138 = vector.load %arg6[%c1_79, %c0_80, %c0_81] : memref<2x20x80xf32, #tpu.memory_space<vmem>>, vector<1x20x80xf32>
    %139 = vector.shape_cast %138 : vector<1x20x80xf32> to vector<20x80xf32>
    %cst_82 = arith.constant dense<0.000000e+00> : vector<2x80xf32>
    %140 = tpu.matmul %137, %139, %cst_82 {dimension_numbers = #tpu.dot_dimension_numbers<[1], [0], [0], [1], [0, 0, 1, 1], [], []>} : vector<2x20xf32>, vector<20x80xf32>, vector<2x80xf32> -> vector<2x80xf32>
    %c1_83 = arith.constant 1 : index
    %c0_84 = arith.constant 0 : index
    %c0_85 = arith.constant 0 : index
    %141 = vector.load %arg7[%c1_83, %c0_84, %c0_85] : memref<2x1x80xf32, #tpu.memory_space<vmem>>, vector<1x1x80xf32>
    %142 = vector.shape_cast %141 : vector<1x1x80xf32> to vector<1x80xf32>
    %143 = vector.broadcast %142 : vector<1x80xf32> to vector<2x80xf32>
    %144 = arith.addf %140, %143 : vector<2x80xf32>
    %cst_86 = arith.constant 0.000000e+00 : f32
    %145 = vector.broadcast %cst_86 : f32 to vector<2x80xf32>
    %146 = arith.maximumf %144, %145 : vector<2x80xf32>
    %c1_87 = arith.constant 1 : index
    %c0_88 = arith.constant 0 : index
    %c0_89 = arith.constant 0 : index
    %147 = vector.load %arg8[%c1_87, %c0_88, %c0_89] : memref<2x80x20xf32, #tpu.memory_space<vmem>>, vector<1x80x20xf32>
    %148 = vector.shape_cast %147 : vector<1x80x20xf32> to vector<80x20xf32>
    %cst_90 = arith.constant dense<0.000000e+00> : vector<2x20xf32>
    %149 = tpu.matmul %146, %148, %cst_90 {dimension_numbers = #tpu.dot_dimension_numbers<[1], [0], [0], [1], [0, 0, 1, 1], [], []>} : vector<2x80xf32>, vector<80x20xf32>, vector<2x20xf32> -> vector<2x20xf32>
    %c1_91 = arith.constant 1 : index
    %c0_92 = arith.constant 0 : index
    %c0_93 = arith.constant 0 : index
    %150 = vector.load %arg9[%c1_91, %c0_92, %c0_93] : memref<2x1x20xf32, #tpu.memory_space<vmem>>, vector<1x1x20xf32>
    %151 = vector.shape_cast %150 : vector<1x1x20xf32> to vector<1x20xf32>
    %152 = vector.broadcast %151 : vector<1x20xf32> to vector<2x20xf32>
    %153 = arith.addf %149, %152 : vector<2x20xf32>
    %c0_94 = arith.constant 0 : index
    %c0_95 = arith.constant 0 : index
    %154 = vector.load %arg10[%c0_94, %c0_95] : memref<20x1200xf32, #tpu.memory_space<vmem>>, vector<20x1200xf32>
    %cst_96 = arith.constant dense<0.000000e+00> : vector<2x1200xf32>
    %155 = tpu.matmul %153, %154, %cst_96 {dimension_numbers = #tpu.dot_dimension_numbers<[1], [0], [0], [1], [0, 0, 1, 1], [], []>} : vector<2x20xf32>, vector<20x1200xf32>, vector<2x1200xf32> -> vector<2x1200xf32>
    %c0_97 = arith.constant 0 : index
    %c0_98 = arith.constant 0 : index
    %156 = vector.load %arg11[%c0_97, %c0_98] : memref<1x1200xf32, #tpu.memory_space<vmem>>, vector<1x1200xf32>
    %157 = vector.broadcast %156 : vector<1x1200xf32> to vector<2x1200xf32>
    %158 = arith.addf %155, %157 : vector<2x1200xf32>
    %cst_99 = arith.constant 0.000000e+00 : f32
    %159 = vector.broadcast %cst_99 : f32 to vector<2x1200xf32>
    %160 = arith.maximumf %158, %159 : vector<2x1200xf32>
    %c0_100 = arith.constant 0 : index
    %c0_101 = arith.constant 0 : index
    %161 = vector.load %arg12[%c0_100, %c0_101] : memref<1200x128xf32, #tpu.memory_space<vmem>>, vector<1200x128xf32>
    %cst_102 = arith.constant dense<0.000000e+00> : vector<2x128xf32>
    %162 = tpu.matmul %160, %161, %cst_102 {dimension_numbers = #tpu.dot_dimension_numbers<[1], [0], [0], [1], [0, 0, 1, 1], [], []>} : vector<2x1200xf32>, vector<1200x128xf32>, vector<2x128xf32> -> vector<2x128xf32>
    %c0_103 = arith.constant 0 : index
    %c0_104 = arith.constant 0 : index
    %163 = vector.load %arg13[%c0_103, %c0_104] : memref<1x128xf32, #tpu.memory_space<vmem>>, vector<1x128xf32>
    %164 = vector.broadcast %163 : vector<1x128xf32> to vector<2x128xf32>
    %165 = arith.addf %162, %164 : vector<2x128xf32>
    %cst_105 = arith.constant 0.000000e+00 : f32
    %166 = vector.broadcast %cst_105 : f32 to vector<2x128xf32>
    %167 = arith.maximumf %165, %166 : vector<2x128xf32>
    %c0_106 = arith.constant 0 : index
    %c0_107 = arith.constant 0 : index
    %168 = vector.load %arg14[%c0_106, %c0_107] : memref<128x128xf32, #tpu.memory_space<vmem>>, vector<128x128xf32>
    %cst_108 = arith.constant dense<0.000000e+00> : vector<2x128xf32>
    %169 = tpu.matmul %167, %168, %cst_108 {dimension_numbers = #tpu.dot_dimension_numbers<[1], [0], [0], [1], [0, 0, 1, 1], [], []>} : vector<2x128xf32>, vector<128x128xf32>, vector<2x128xf32> -> vector<2x128xf32>
    %c0_109 = arith.constant 0 : index
    %c0_110 = arith.constant 0 : index
    %170 = vector.load %arg15[%c0_109, %c0_110] : memref<1x128xf32, #tpu.memory_space<vmem>>, vector<1x128xf32>
    %171 = vector.broadcast %170 : vector<1x128xf32> to vector<2x128xf32>
    %172 = arith.addf %169, %171 : vector<2x128xf32>
    %c0_111 = arith.constant 0 : index
    %c0_112 = arith.constant 0 : index
    %173 = vector.load %arg16[%c0_111, %c0_112] : memref<2x128xf32, #tpu.memory_space<vmem>>, vector<2x128xf32>
    tpu.vector_store %arg16[%c0_111, %c0_112], %172 {strides = array<i32>} : memref<2x128xf32, #tpu.memory_space<vmem>>, vector<2x128xf32>,
    return
  }
  func.func @transform_0(%arg0: i32, %arg1: memref<2x8xi32, #tpu.memory_space<smem>>) -> (i32, i32) {
    %c0_i32 = arith.constant 0 : i32
    %c0_i32_0 = arith.constant 0 : i32
    %c0_i32_1 = arith.constant 0 : i32
    return %c0_i32, %c0_i32_0 : i32, i32
  }
  func.func @transform_1(%arg0: i32, %arg1: memref<2x8xi32, #tpu.memory_space<smem>>) -> (i32, i32) {
    %c0_i32 = arith.constant 0 : i32
    %c0_i32_0 = arith.constant 0 : i32
    %c0_i32_1 = arith.constant 0 : i32
    return %c0_i32, %c0_i32_0 : i32, i32
  }
  func.func @transform_2(%arg0: i32, %arg1: memref<2x8xi32, #tpu.memory_space<smem>>) -> (i32, i32, i32) {
    %c0_i32 = arith.constant 0 : i32
    %c0_i32_0 = arith.constant 0 : i32
    %c0_i32_1 = arith.constant 0 : i32
    %c0_i32_2 = arith.constant 0 : i32
    return %c0_i32, %c0_i32_0, %c0_i32_1 : i32, i32, i32
  }
  func.func @transform_3(%arg0: i32, %arg1: memref<2x8xi32, #tpu.memory_space<smem>>) -> (i32, i32, i32) {
    %c0_i32 = arith.constant 0 : i32
    %c0_i32_0 = arith.constant 0 : i32
    %c0_i32_1 = arith.constant 0 : i32
    %c0_i32_2 = arith.constant 0 : i32
    return %c0_i32, %c0_i32_0, %c0_i32_1 : i32, i32, i32
  }
  func.func @transform_4(%arg0: i32, %arg1: memref<2x8xi32, #tpu.memory_space<smem>>) -> (i32, i32, i32) {
    %c0_i32 = arith.constant 0 : i32
    %c0_i32_0 = arith.constant 0 : i32
    %c0_i32_1 = arith.constant 0 : i32
    %c0_i32_2 = arith.constant 0 : i32
    return %c0_i32, %c0_i32_0, %c0_i32_1 : i32, i32, i32
  }
  func.func @transform_5(%arg0: i32, %arg1: memref<2x8xi32, #tpu.memory_space<smem>>) -> (i32, i32, i32) {
    %c0_i32 = arith.constant 0 : i32
    %c0_i32_0 = arith.constant 0 : i32
    %c0_i32_1 = arith.constant 0 : i32
    %c0_i32_2 = arith.constant 0 : i32
    return %c0_i32, %c0_i32_0, %c0_i32_1 : i32, i32, i32
  }
  func.func @transform_6(%arg0: i32, %arg1: memref<2x8xi32, #tpu.memory_space<smem>>) -> (i32, i32, i32) {
    %c0_i32 = arith.constant 0 : i32
    %c0_i32_0 = arith.constant 0 : i32
    %c0_i32_1 = arith.constant 0 : i32
    %c0_i32_2 = arith.constant 0 : i32
    return %c0_i32, %c0_i32_0, %c0_i32_1 : i32, i32, i32
  }
  func.func @transform_7(%arg0: i32, %arg1: memref<2x8xi32, #tpu.memory_space<smem>>) -> (i32, i32, i32) {
    %c0_i32 = arith.constant 0 : i32
    %c0_i32_0 = arith.constant 0 : i32
    %c0_i32_1 = arith.constant 0 : i32
    %c0_i32_2 = arith.constant 0 : i32
    return %c0_i32, %c0_i32_0, %c0_i32_1 : i32, i32, i32
  }
  func.func @transform_8(%arg0: i32, %arg1: memref<2x8xi32, #tpu.memory_space<smem>>) -> (i32, i32) {
    %c0_i32 = arith.constant 0 : i32
    %c0_i32_0 = arith.constant 0 : i32
    %c0_i32_1 = arith.constant 0 : i32
    return %c0_i32, %c0_i32_0 : i32, i32
  }
  func.func @transform_9(%arg0: i32, %arg1: memref<2x8xi32, #tpu.memory_space<smem>>) -> (i32, i32) {
    %c0_i32 = arith.constant 0 : i32
    %c0_i32_0 = arith.constant 0 : i32
    %c0_i32_1 = arith.constant 0 : i32
    return %c0_i32, %c0_i32_0 : i32, i32
  }
  func.func @transform_10(%arg0: i32, %arg1: memref<2x8xi32, #tpu.memory_space<smem>>) -> (i32, i32) {
    %c0_i32 = arith.constant 0 : i32
    %c0_i32_0 = arith.constant 0 : i32
    %c0_i32_1 = arith.constant 0 : i32
    return %c0_i32, %c0_i32_0 : i32, i32
  }
  func.func @transform_11(%arg0: i32, %arg1: memref<2x8xi32, #tpu.memory_space<smem>>) -> (i32, i32) {
    %c0_i32 = arith.constant 0 : i32
    %c0_i32_0 = arith.constant 0 : i32
    %c0_i32_1 = arith.constant 0 : i32
    return %c0_i32, %c0_i32_0 : i32, i32
  }
  func.func @transform_12(%arg0: i32, %arg1: memref<2x8xi32, #tpu.memory_space<smem>>) -> (i32, i32) {
    %c0_i32 = arith.constant 0 : i32
    %c0_i32_0 = arith.constant 0 : i32
    %c0_i32_1 = arith.constant 0 : i32
    return %c0_i32, %c0_i32_0 : i32, i32
  }
  func.func @transform_13(%arg0: i32, %arg1: memref<2x8xi32, #tpu.memory_space<smem>>) -> (i32, i32) {
    %c0_i32 = arith.constant 0 : i32
    %c0_i32_0 = arith.constant 0 : i32
    %c0_i32_1 = arith.constant 0 : i32
    return %c0_i32, %c0_i32_0 : i32, i32
  }
  func.func @transform_14(%arg0: i32, %arg1: memref<2x8xi32, #tpu.memory_space<smem>>) -> (i32, i32) {
    %c0_i32 = arith.constant 0 : i32
    %c0_i32_0 = arith.constant 0 : i32
    return %arg0, %c0_i32 : i32, i32
  }
}

</mosaic_0001>

<bundles_post_ra>
// kernel: transformer_forward.1
= control target key start
LH: loop header
LB: loop body
LE: loop exit
PB: predicated region body
PF: predicated region fallthrough
CT: control target
= control target key end

     0   :  { %s3356_s0 = inlined_call_operand.vmem [shape: s32[2,8], index: 0, kind: input, shape index: {}]   ;;  %s3357_s1 = inlined_call_operand.vmem [shape: f32[50,20], index: 1, kind: input, shape index: {}]   ;;  %s3358_s2 = inlined_call_operand.vmem [shape: f32[1,20], index: 2, kind: input, shape index: {}]   ;;  %s3359_s3 = inlined_call_operand.vmem [shape: f32[2,20,20], index: 3, kind: input, shape index: {}]   ;;  %s3360_s4 = inlined_call_operand.hbm [shape: f32[2,1,20], index: 4, kind: input, shape index: {}]   ;;  %s3361_s5 = inlined_call_operand.vmem [shape: f32[2,20,80], index: 5, kind: input, shape index: {}]   ;;  %s3362_s6 = inlined_call_operand.hbm [shape: f32[2,1,80], index: 6, kind: input, shape index: {}]   ;;  %s3363_s7 = inlined_call_operand.vmem [shape: f32[2,80,20], index: 7, kind: input, shape index: {}]   ;;  %s3364_s8 = inlined_call_operand.hbm [shape: f32[2,1,20], index: 8, kind: input, shape index: {}]   ;;  %s3365_s9 = inlined_call_operand.vmem [shape: f32[20,1200], index: 9, kind: input, shape index: {}]   ;;  %s3366_s10 = inlined_call_operand.vmem [shape: f32[1,1200], index: 10, kind: input, shape index: {}]   ;;  %s3367_s11 = inlined_call_operand.hbm [shape: f32[1200,128], index: 11, kind: input, shape index: {}]   ;;  %s3368_s12 = inlined_call_operand.hbm [shape: f32[1,128], index: 12, kind: input, shape index: {}]   ;;  %s3369_s13 = inlined_call_operand.vmem [shape: f32[128,128], index: 13, kind: input, shape index: {}]   ;;  %s3370_s14 = inlined_call_operand.hbm [shape: f32[1,128], index: 14, kind: input, shape index: {}]   ;;  %s3371_s15 = inlined_call_operand.hbm [shape: f32[2,128], index: 15, kind: output, shape index: {}]  }
   0x1   :  { %3375 = sst [smem:[#allocation23_spill]] %s3371_s15  ;;  %s20_s20 = sshll.u32 %s3356_s0, 4  ;;  %s21_s20 = int_to_ptr.vmem [resolvable:$true] %s20_s20 }
   0x2   :  { %s2518_s21 = scalar_lea.vmem %s21_s20, 32  ;;  %p2523_p1 = scmp.lt.s32.totalorder %s21_s20, %s21_s20 }
   0x3   :  { %p2519_p0 = scmp.ne.s32.totalorder %s21_s20, %s2518_s21  ;;  %p2524_p2 = scmp.lt.s32.totalorder %s2518_s21, %s2518_s21 }
   0x5   :  { %p2525_p3 = por %p2524_p2, %p2523_p1 }
   0x7   :  { %p2526_p4 = pnand %p2525_p3, %p2519_p0 }
   0x9   :  { %2529 = shalt.err (!%p2526_p4)  }
   0xa   :  { %s2696_s22 = smov [#allocation4]  }
   0xb   :  { %23 = dma.vmem_to_smem %s21_s20, 32, %s2696_s22, [#allocation3] }
   0xc   :  { %2684 = dma.done.wait [#allocation3], 32 }
   0xd   :  { %2685 = vsyncadd [#allocation3], 4294967264 }
   0xe   :  { %25 = sfence }
   0xf   :  { %26 = vsyncpa [#allocation6], 0 }
  0x10   :  { %27 = vsyncpa [#allocation9], 0 }
  0x11   :  { %28 = vsyncpa [#allocation12], 0 }
  0x12   :  { %29 = vsyncpa [#allocation15], 0 }
  0x13   :  { %30 = vsyncpa [#allocation7], 0  ;;  %s2697_s23 = smov [#allocation8]   ;;  %s2698_s24 = smov [#allocation11]  }
  0x14   :  { %s56_s0 = sshll.u32 %s2697_s23, 4  ;;  %s86_s25 = sshll.u32 %s2698_s24, 4  ;;  %s57_s0 = int_to_ptr.vmem [resolvable:$true] %s56_s0  ;;  %s2794_s25 = int_to_ptr.vmem [resolvable:$true] %s86_s25 }
  0x15   :  { %s2530_s28 = scalar_lea.hbm %s3362_s6, 32 }
  0x16   :  { %p2531_p5 = scmp.ne.s32.totalorder %s3362_s6, %s2530_s28  ;;  %p2534_p6 = scmp.lt.u32.totalorder %s2530_s28, %s3362_s6 }
  0x18   :  { %p2536_p7 = pnand %p2534_p6, %p2531_p5 }
  0x1a   :  { %2539 = shalt.err (!%p2536_p7)
}
  0x1b   :  { %s2540_s18 = scalar_lea.vmem %s57_s0, 32  ;;  %p2545_p9 = scmp.lt.s32.totalorder %s57_s0, %s57_s0 }
  0x1c   :  { %p2541_p8 = scmp.ne.s32.totalorder %s57_s0, %s2540_s18  ;;  %p2546_p10 = scmp.lt.s32.totalorder %s2540_s18, %s2540_s18 }
  0x1e   :  { %p2547_p11 = por %p2546_p10, %p2545_p9 }
  0x20   :  { %p2548_p12 = pnand %p2547_p11, %p2541_p8 }
  0x22   :  { %2551 = shalt.err (!%p2548_p12)
}
  0x23   :  { %s3372_s19 = smov 16   ;;  %s2700_s20 = smov 1  }
  0x24   :  { %62 = dma.hbm_to_vmem [thread:$0]  %s3362_s6, 32, %s57_s0, [#allocation9], %s3372_s19, %s3372_s19, %s2700_s20  }
  0x25   :  { %s2552_s26 = scalar_lea.hbm %s3367_s11, 19200 }
  0x26   :  { %p2553_p13 = scmp.ne.s32.totalorder %s3367_s11, %s2552_s26  ;;  %p2556_p0 = scmp.lt.u32.totalorder %s2552_s26, %s3367_s11 }
  0x28   :  { %p2558_p1 = pnand %p2556_p0, %p2553_p13 }
  0x2a   :  { %2561 = shalt.err (!%p2558_p1)
}
  0x2b   :  { %s2562_s16 = scalar_lea.vmem %s2794_s25, 19200  ;;  %p2567_p3 = scmp.lt.s32.totalorder %s2794_s25, %s2794_s25 }
  0x2c   :  { %p2563_p2 = scmp.ne.s32.totalorder %s2794_s25, %s2562_s16  ;;  %p2568_p4 = scmp.lt.s32.totalorder %s2562_s16, %s2562_s16 }
  0x2e   :  { %p2569_p5 = por %p2568_p4, %p2567_p3 }
  0x30   :  { %p2570_p6 = pnand %p2569_p5, %p2563_p2 }
  0x32   :  { %2573 = shalt.err (!%p2570_p6)
}
  0x33   :  { %s2701_s6 = smov 128   ;;  %s2702_s0 = smov 8  }
  0x34   :  { %92 = dma.hbm_to_vmem [thread:$0]  %s3367_s11, 19200, %s2794_s25, [#allocation12], %s2701_s6, %s2701_s6, %s2702_s0  }
  0x35   :  { %s2703_s21 = smov [#allocation5]   ;;  %s2704_s23 = smov [#allocation10]  }
  0x36   :  { %s42_s22 = sshll.u32 %s2703_s21, 4  ;;  %s70_s24 = sshll.u32 %s2704_s23, 4  ;;  %s43_s22 = int_to_ptr.vmem [resolvable:$true] %s42_s22  ;;  %s2828_s24 = int_to_ptr.vmem [resolvable:$true] %s70_s24 }
  0x37   :  { %s2574_s28 = scalar_lea.hbm %s3360_s4, 32 }
  0x38   :  { %p2575_p7 = scmp.ne.s32.totalorder %s3360_s4, %s2574_s28  ;;  %p2578_p8 = scmp.lt.u32.totalorder %s2574_s28, %s3360_s4 }
  0x3a   :  { %p2580_p9 = pnand %p2578_p8, %p2575_p7 }
  0x3c   :  { %2583 = shalt.err (!%p2580_p9)
}
  0x3d   :  { %s2584_s11 = scalar_lea.vmem %s43_s22, 32  ;;  %p2589_p11 = scmp.lt.s32.totalorder %s43_s22, %s43_s22 }
  0x3e   :  { %p2585_p10 = scmp.ne.s32.totalorder %s43_s22, %s2584_s11  ;;  %p2590_p12 = scmp.lt.s32.totalorder %s2584_s11, %s2584_s11 }
  0x40   :  { %p2591_p13 = por %p2590_p12, %p2589_p11 }
  0x42   :  { %p2592_p0 = pnand %p2591_p13, %p2585_p10 }
  0x44   :  { %2595 = shalt.err (!%p2592_p0)
}
  0x45   :  { %s3376_s25 = smov 16   ;;  %s2596_s19 = scalar_lea.hbm %s3364_s8, 32 }
  0x46   :  { %48 = dma.hbm_to_vmem [thread:$0]  %s3360_s4, 32, %s43_s22, [#allocation6], %s3376_s25, %s3376_s25, %s2700_s20  }
  0x47   :  { %p2597_p1 = scmp.ne.s32.totalorder %s3364_s8, %s2596_s19  ;;  %p2600_p2 = scmp.lt.u32.totalorder %s2596_s19, %s3364_s8 }
  0x49   :  { %p2602_p3 = pnand %p2600_p2, %p2597_p1 }
  0x4b   :  { %2605 = shalt.err (!%p2602_p3)
}
  0x4c   :  { %s2606_s28 = scalar_lea.vmem %s2828_s24, 32  ;;  %p2611_p5 = scmp.lt.s32.totalorder %s2828_s24, %s2828_s24 }
  0x4d   :  { %p2607_p4 = scmp.ne.s32.totalorder %s2828_s24, %s2606_s28  ;;  %p2612_p6 = scmp.lt.s32.totalorder %s2606_s28, %s2606_s28 }
  0x4f   :  { %p2613_p7 = por %p2612_p6, %p2611_p5 }
  0x51   :  { %p2614_p8 = pnand %p2613_p7, %p2607_p4 }
  0x53   :  { %2617 = shalt.err (!%p2614_p8)
}
  0x54   :  { %76 = dma.hbm_to_vmem [thread:$0]  %s3364_s8, 32, %s2828_s24, [#allocation9], %s3376_s25, %s3376_s25, %s2700_s20  }
  0x55   :  { %s2705_s29 = smov [#allocation13]   ;;  %s2706_s16 = smov [#allocation14]  }
  0x56   :  { %s99_s30 = sshll.u32 %s2705_s29, 4  ;;  %s111_s11 = sshll.u32 %s2706_s16, 4  ;;  %s100_s30 = int_to_ptr.vmem [resolvable:$true] %s99_s30  ;;  %s112_s11 = int_to_ptr.vmem [resolvable:$true] %s111_s11 }
  0x57   :  { %s2618_s17 = scalar_lea.hbm %s3368_s12, 16 }
  0x58   :  { %p2619_p9 = scmp.ne.s32.totalorder %s3368_s12, %s2618_s17  ;;  %p2622_p10 = scmp.lt.u32.totalorder %s2618_s17, %s3368_s12 }
  0x5a   :  { %p2624_p11 = pnand %p2622_p10, %p2619_p9 }
  0x5c   :  { %2627 = shalt.err (!%p2624_p11)
}
  0x5d   :  { %s2628_s8 = scalar_lea.vmem %s100_s30, 16  ;;  %s2632_s20 = scalar_lea.vmem %s100_s30, 32 }
  0x5e   :  { %p2629_p12 = scmp.ne.s32.totalorder %s100_s30, %s2628_s8  ;;  %p2633_p13 = scmp.lt.s32.totalorder %s100_s30, %s100_s30 }
  0x5f   :  { %p2634_p0 = scmp.lt.s32.totalorder %s2632_s20, %s2628_s8 }
  0x61   :  { %p2635_p1 = por %p2634_p0, %p2633_p13 }
  0x63   :  { %p2636_p2 = pnand %p2635_p1, %p2629_p12 }
  0x65   :  { %2639 = shalt.err (!%p2636_p2)
}
  0x66   :  { %102 = dma.hbm_to_vmem [thread:$0]  %s3368_s12, 16, %s100_s30, [#allocation12]  }
  0x67   :  { %s2640_s28 = scalar_lea.hbm %s3370_s14, 16 }
  0x68   :  { %p2641_p3 = scmp.ne.s32.totalorder %s3370_s14, %s2640_s28  ;;  %p2644_p4 = scmp.lt.u32.totalorder %s2640_s28, %s3370_s14 }
  0x6a   :  { %p2646_p5 = pnand %p2644_p4, %p2641_p3 }
  0x6c   :  { %2649 = shalt.err (!%p2646_p5)
}
  0x6d   :  { %s2650_s6 = scalar_lea.vmem %s112_s11, 16  ;;  %s2654_s0 = scalar_lea.vmem %s112_s11, 32 }
  0x6e   :  { %p2651_p6 = scmp.ne.s32.totalorder %s112_s11, %s2650_s6  ;;  %p2655_p7 = scmp.lt.s32.totalorder %s112_s11, %s112_s11 }
  0x6f   :  { %p2656_p8 = scmp.lt.s32.totalorder %s2654_s0, %s2650_s6 }
  0x71   :  { %p2657_p9 = por %p2656_p8, %p2655_p7 }
  0x73   :  { %p2658_p10 = pnand %p2657_p9, %p2651_p6 }
  0x75   :  { %2661 = shalt.err (!%p2658_p10)
}
  0x76   :  { %114 = dma.hbm_to_vmem [thread:$0]  %s3370_s14, 16, %s112_s11, [#allocation15]  }
  0x77   :  { %2686 = dma.done.wait [#allocation6], 32  }
  0x78   :  { %2687 = vsyncadd [#allocation6], 4294967264 }
  0x79   :  { %2688 = dma.done.wait [#allocation9], 64  }
  0x7a   :  { %2689 = vsyncadd [#allocation9], 4294967232 }
  0x7b   :  { %2690 = dma.done.wait [#allocation12], 19216  }
  0x7c   :  { %2691 = vsyncadd [#allocation12], 4294948080 }
  0x7d   :  { %2692 = dma.done.wait [#allocation15], 16  }
  0x7e   :  { %2693 = vsyncadd [#allocation15], 4294967280  ;;  %v2707_v0 = vmov 0.0|0.0   ;;  %vm2708_vm0 = vmmov 0   ;;  %v2709_v1 = vmov 0.0   ;;  %s136_s17 = sld [smem:[#allocation4]]  ;;  %v227_v57 = vlaneseq }
  0x7f   :  { %2256 = vmatprep.subr.bf16.mxu0 %v2707_v0  ;;  %2145 = vmatprep.mubr.msk.f32.mxu0 %vm2708_vm0, %v2709_v1  ;;  %s1881_s18 = sld [smem:[#allocation4 + $0x1]]  ;;  %s1882_s19 = sld [smem:[#allocation4 + $0x2]]  ;;  %v221_v2 = vld [vmem:[%s3359_s3] sm:$0xff]  ;;  %v222_v3 = vld [vmem:[%s3359_s3 + $0x8] sm:$0xff]  ;;  %v223_v12 = vld [vmem:[%s3359_s3 + $0x10] sm:$0xf] }
  0x80   :  { %s2892_s14 = sld [smem:[#allocation4 + $0x3]]  ;;  %2259 = vmatprep.subr.bf16.mxu1 %v2707_v0  ;;  %2154 = vmatprep.mubr.msk.f32.mxu1 %vm2708_vm0, %v2709_v1  ;;  %s2897_s11 = sld [smem:[#allocation4 + $0x4]]  ;;  %v2257_v4 = vpack.c.bf16 %v222_v3, %v221_v2  ;;  %v134_v5 = vld [vmem:[%s3358_s2] sm:$0x1]  ;;  %vm236_vm1 = vcmask 1043456   ;;  %v311_v14 = vld [vmem:[%s3361_s5 + $0x8] sm:$0xff] }
  0x81   :  { %s2899_s21 = sld [smem:[#allocation4 + $0x5]]  ;;  %s2901_s23 = sld [smem:[#allocation4 + $0x6]]  ;;  %v177_v10 = vld [vmem:[%s3358_s2] sm:$0x1]  ;;  %vm175_vm2 = vcmask 155648   ;;  %vm232_vm3 = vcmask 162816  }
  0x82   :  { %s2903_s8 = sld [smem:[#allocation4 + $0x80]]  ;;  %s2905_s20 = sld [smem:[#allocation4 + $0x81]]  ;;  %2258 = vmatpush3.bf16.msra.mxu0 %v2257_v4  ;;  %v310_v11 = vld [vmem:[%s3361_s5] sm:$0xff]  ;;  %v312_v44 = vld [vmem:[%s3361_s5 + $0x10] sm:$0xf]  ;;  %v398_v46 = vld [vmem:[%s3363_s7 + $0x8] sm:$0xff] }
  0x83   :  { %s2907_s24 = sld [smem:[#allocation4 + $0x82]]  ;;  %s2909_s25 = sld [smem:[#allocation4 + $0x83]]  ;;  %2143 = vmatprep.subr.mxu0 %v2709_v1  ;;  %v2260_v18 = vpack.c.bf16 %v311_v14, %v310_v11  ;;  %v397_v45 = vld [vmem:[%s3363_s7] sm:$0xff]  ;;  %v399_v47 = vld [vmem:[%s3363_s7 + $0x10] sm:$0xff]  ;;  %v400_v49 = vld [vmem:[%s3363_s7 + $0x18] sm:$0xff]  ;;  %v3031_v58 = vshrl.u32 %v227_v57, 7 }
  0x84   :  { %s137_s16 = scalar_lea.vmem %s3357_s1, %s136_s17  ;;  %s1894_s26 = sld [smem:[#allocation4 + $0x86]]  ;;  %v2263_v48 = vpack.c.bf16 %v398_v46, %v397_v45  ;;  %v2266_v50 = vpack.c.bf16 %v400_v49, %v399_v47  ;;  %v401_v51 = vld [vmem:[%s3363_s7 + $0x20] sm:$0xff]  ;;  %v402_v52 = vld [vmem:[%s3363_s7 + $0x28] sm:$0xff]  ;;  %v403_v54 = vld [vmem:[%s3363_s7 + $0x30] sm:$0xff]  ;;  %vm414_vm4 = vcmask 654336   ;;  %vm1398_vm5 = vcmask 392192  }
  0x85   :  { %s142_s12 = scalar_lea.vmem %s3357_s1, %s1881_s18  ;;  %v138_v6 = vld [vmem:[%s137_s16] sm:$0x1]  ;;  %s147_s28 = scalar_lea.vmem %s3357_s1, %s1882_s19  ;;  %2261 = vmatpush3.bf16.msra.mxu1 %v2260_v18  ;;  %v2269_v53 = vpack.c.bf16 %v402_v52, %v401_v51  ;;  %v404_v55 = vld [vmem:[%s3363_s7 + $0x38] sm:$0xff]  ;;  %v224_v59 = vld [vmem:[#allocation5] sm:$0x1]  ;;  %v3034_v61 = vsub.s32 0, %v3031_v58 }
  0x86   :  { %v143_v7 = vld [vmem:[%s142_s12] sm:$0x1]  ;;  %v139_v8 = vadd.f32 %v138_v6, %v134_v5  ;;  %s152_s22 = scalar_lea.vmem %s3357_s1, %s2892_s14  ;;  %s2933_s18 = sld [smem:[#allocation4 + $0x7]]  ;;  %2144 = vmatpush3.msk.msra.mxu0 %vm236_vm1, %v223_v12  ;;  %2152 = vmatprep.subr.mxu1 %v2709_v1  ;;  %v2272_v56 = vpack.c.bf16 %v404_v55, %v403_v54  ;;  %v225_v60 = vmul.f32 8.0, %v224_v59  ;;  %v406_v5 = vld [vmem:[%s3363_s7 + $0x48] sm:$0xff]  ;;  %v770_v47 = vld [vmem:[%s3365_s9 + $0x58] sm:$0xff] }
  0x87   :  { %v148_v9 = vld [vmem:[%s147_s28] sm:$0x1]  ;;  %s157_s16 = scalar_lea.vmem %s3357_s1, %s2897_s11  ;;  %s162_s0 = scalar_lea.vmem %s3357_s1, %s2899_s21  ;;  %2262 = vmatprep.subr.bf16.mxu0 %v2707_v0  ;;  %v760_v46 = vld [vmem:[%s3365_s9 + $0x8] sm:$0xff]  ;;  %v766_v51 = vld [vmem:[%s3365_s9 + $0x38] sm:$0xff] }
  0x88   :  { %v144_v13 = vadd.f32 %v143_v7, %v139_v8  ;;  %s181_s11 = scalar_lea.vmem %s3357_s1, %s2903_s8  ;;  %s186_s2 = scalar_lea.vmem %s3357_s1, %s2905_s20  ;;  %v153_v15 = vld [vmem:[%s152_s22] sm:$0x1]  ;;  %v230_v62 = vrot.slane %v225_v60, %v3034_v61  ;;  %v1903_v7 = vld [vmem:[%s3359_s3 + $0x18] sm:$0xff]  ;;  %v2298_v49 = vpack.c.bf16 %v770_v47, %v760_v46  ;;  %v776_v52 = vld [vmem:[%s3365_s9 + $0x88] sm:$0xff] }
  0x89   :  { %v182_v16 = vld [vmem:[%s181_s11] sm:$0x1]  ;;  %s191_s8 = scalar_lea.vmem %s3357_s1, %s2907_s24  ;;  %s196_s30 = scalar_lea.vmem %s3357_s1, %s2909_s25  ;;  %2153 = vmatpush3.msk.msra.mxu1 %vm236_vm1, %v312_v44  ;;  %v1923_v44 = vld [vmem:[%s3363_s7 + $0x98] sm:$0xff]  ;;  %v2310_v54 = vpack.c.bf16 %v776_v52, %v766_v51  ;;  %v1911_v55 = vld [vmem:[#allocation8 + $0x1] ss:$0 sm:$0xff] }
  0x8a   :  { %v187_v17 = vld [vmem:[%s186_s2] sm:$0x1]  ;;  %v149_v19 = vadd.f32 %v148_v9, %v144_v13  ;;  %v183_v21 = vadd.f32 %v182_v16, %v177_v10  ;;  %s1892_s22 = sld [smem:[#allocation4 + $0x84]]  ;;  %s1893_s21 = sld [smem:[#allocation4 + $0x85]]  ;;  %2277 = vmatprep.subr.bf16.mxu1 %v2707_v0  ;;  %v1898_v10 = vld [vmem:[#allocation8] ss:$0 sm:$0xff] }
  0x8b   :  { %v158_v20 = vld [vmem:[%s157_s16] sm:$0x1]  ;;  %s167_s24 = scalar_lea.vmem %s3357_s1, %s2901_s23  ;;  %s1895_s16 = sld [smem:[#allocation4 + $0x87]]  ;;  %v1901_v16 = vld [vmem:[#allocation10] ss:$0 sm:$0xff]  ;;  %v1246_v46 = vld [vmem:[#allocation11 + $0x28] sm:$0xff] }
  0x8c   :  { %v192_v22 = vld [vmem:[%s191_s8] sm:$0x1]  ;;  %v154_v23 = vadd.f32 %v153_v15, %v149_v19  ;;  %v188_v24 = vadd.f32 %v187_v17, %v183_v21  ;;  %s172_s4 = scalar_lea.vmem %s3357_s1, %s2933_s18  ;;  %s211_s12 = scalar_lea.vmem %s3357_s1, %s1894_s26  ;;  %v1905_v15 = vld [vmem:[%s3359_s3 + $0x28] sm:$0xf]  ;;  %v1908_v17 = vld [vmem:[%s3361_s5 + $0x18] sm:$0xff] }
  0x8d   :  { %v163_v25 = vld [vmem:[%s162_s0] sm:$0x1]  ;;  %v788_v52 = vld [vmem:[%s3365_s9 + $0xe8] sm:$0xf] }
  0x8e   :  { %v197_v26 = vld [vmem:[%s196_s30] sm:$0x1]  ;;  %v159_v27 = vadd.f32 %v158_v20, %v154_v23  ;;  %v193_v28 = vadd.f32 %v192_v22, %v188_v24  ;;  %v1910_v24 = vld [vmem:[%s3361_s5 + $0x28] sm:$0xf] }
  0x8f   :  { %v168_v29 = vld [vmem:[%s167_s24] sm:$0x1] }
  0x90   :  { %v164_v30 = vadd.f32 %v163_v25, %v159_v27  ;;  %v198_v31 = vadd.f32 %v197_v26, %v193_v28  ;;  %s201_s23 = scalar_lea.vmem %s3357_s1, %s1892_s22  ;;  %v173_v32 = vld [vmem:[%s172_s4] sm:$0x1]  ;;  %s206_s6 = scalar_lea.vmem %s3357_s1, %s1893_s21  ;;  %v494_v25 = vld [vmem:[#allocation5 + $0x1] sm:$0x1]  ;;  %v1914_v28 = vld [vmem:[%s3363_s7 + $0x50] sm:$0xff] }
  0x91   :  { %v202_v33 = vld [vmem:[%s201_s23] sm:$0x1]  ;;  %s216_s20 = scalar_lea.vmem %s3357_s1, %s1895_s16  ;;  %v495_v26 = vmul.f32 8.0, %v494_v25  ;;  %v782_v25 = vld [vmem:[%s3365_s9 + $0xb8] sm:$0xf] }
  0x92   :  { %v169_v34 = vadd.f32 %v168_v29, %v164_v30  ;;  %v203_v35 = vadd.f32 %v202_v33, %v198_v31  ;;  %v207_v36 = vld [vmem:[%s206_s6] sm:$0x1]  ;;  %v1915_v29 = vld [vmem:[%s3363_s7 + $0x58] sm:$0xff] }
  0x93   :  { %v212_v37 = vld [vmem:[%s211_s12] sm:$0x1]  ;;  %v500_v27 = vrot.slane %v495_v26, %v3034_v61  ;;  %v2284_v31 = vpack.c.bf16 %v1915_v29, %v1914_v28  ;;  %v764_v26 = vld [vmem:[%s3365_s9 + $0x28] sm:$0xff] }
  0x94   :  { %v174_v38 = vadd.f32 %v173_v32, %v169_v34  ;;  %v208_v39 = vadd.f32 %v207_v36, %v203_v35  ;;  %v217_v40 = vld [vmem:[%s216_s20] sm:$0x1]  ;;  %v1917_v35 = vld [vmem:[%s3363_s7 + $0x68] sm:$0xff] }
  0x95   :  { %v405_v4 = vld [vmem:[%s3363_s7 + $0x40] sm:$0xff] }
  0x96   :  { %176 = vst.msk [vmem:[#allocation2] sm:$0x1] %vm175_vm2, %v174_v38  ;;  %v213_v41 = vadd.f32 %v212_v37, %v208_v39  ;;  %v2275_v6 = vpack.c.bf16 %v406_v5, %v405_v4  ;;  %v1904_v8 = vld [vmem:[%s3359_s3 + $0x20] sm:$0xff]  ;;  %v1918_v37 = vld [vmem:[%s3363_s7 + $0x70] sm:$0xff]  ;;  %v1919_v38 = vld [vmem:[%s3363_s7 + $0x78] sm:$0xff] }
  0x97   :  { %v2278_v9 = vpack.c.bf16 %v1904_v8, %v1903_v7  ;;  %v1909_v18 = vld [vmem:[%s3361_s5 + $0x20] sm:$0xff]  ;;  %v2290_v39 = vpack.c.bf16 %v1919_v38, %v1918_v37  ;;  %v762_v4 = vld [vmem:[%s3365_s9 + $0x18] sm:$0xff]  ;;  %v772_v5 = vld [vmem:[%s3365_s9 + $0x68] sm:$0xff] }
  0x98   :  { %v218_v42 = vadd.f32 %v217_v40, %v213_v41  ;;  %v2281_v22 = vpack.c.bf16 %v1909_v18, %v1908_v17  ;;  %v1916_v34 = vld [vmem:[%s3363_s7 + $0x60] sm:$0xff]  ;;  %v1921_v41 = vld [vmem:[%s3363_s7 + $0x88] sm:$0xff]  ;;  %v786_v7 = vld [vmem:[%s3365_s9 + $0xd8] sm:$0xf]  ;;  %v2302_v8 = vpack.c.bf16 %v772_v5, %v762_v4 }
  0x99   :  { %v2287_v36 = vpack.c.bf16 %v1917_v35, %v1916_v34  ;;  %v1920_v40 = vld [vmem:[%s3363_s7 + $0x80] sm:$0xff]  ;;  %v1242_v17 = vld [vmem:[#allocation11 + $0x8] sm:$0xff]  ;;  %v1259_v18 = vld [vmem:[#allocation11 + $0x90] sm:$0xff] }
  0x9a   :  { %219 = vst.msk [vmem:[#allocation2 + $0x1] sm:$0x1] %vm175_vm2, %v218_v42  ;;  %v2293_v42 = vpack.c.bf16 %v1921_v41, %v1920_v40  ;;  %v775_v57 = vld [vmem:[%s3365_s9 + $0x80] sm:$0xff]  ;;  %v1261_v35 = vld [vmem:[#allocation11 + $0xa0] sm:$0xff]  ;;  %v778_v41 = vld [vmem:[%s3365_s9 + $0x98] sm:$0xff] }
  0x9b   :  { %v763_v29 = vld [vmem:[%s3365_s9 + $0x20] sm:$0xff]  ;;  %v768_v40 = vld [vmem:[%s3365_s9 + $0x48] sm:$0xff]  ;;  %v1266_v4 = vld [vmem:[#allocation11 + $0xc8] sm:$0xff] }
  0x9c   :  { %v783_v47 = vld [vmem:[%s3365_s9 + $0xc0] sm:$0xf] }
  0x9d   :  { %v787_v5 = vld [vmem:[%s3365_s9 + $0xe0] sm:$0xf] }
  0xa1   :  { %v220_v43 = vld [vmem:[#allocation2] sm:$0x3] }
  0xa2   :  { %2146 = vmatmul.mubr.msk.f32.vlgmr.msra.gmra.mrb[0].mxu0 %vm232_vm3, %v220_v43  ;;  %v1922_v43 = vld [vmem:[%s3363_s7 + $0x90] sm:$0xff] }
  0xa3   :  { %2177 = vmatprep.mubr.msk.f32.mxu0 %vm2708_vm0, %v2709_v1  ;;  %2264 = vmatpush3.bf16.msra.mxu0 %v2263_v48  ;;  %v2296_v45 = vpack.c.bf16 %v1923_v44, %v1922_v43  ;;  %v759_v48 = vld [vmem:[%s3365_s9] sm:$0xff]  ;;  %v777_v44 = vld [vmem:[%s3365_s9 + $0x90] sm:$0xff] }
  0xa4   :  { %2265 = vmatprep.subr.bf16.mxu0 %v2707_v0  ;;  %v767_v43 = vld [vmem:[%s3365_s9 + $0x40] sm:$0xff] }
  0xa5   :  { %v2316_v51 = vpack.c.bf16 %v777_v44, %v767_v43  ;;  %v1281_v44 = vld [vmem:[#allocation11 + $0x140] sm:$0xff] }
  0xa7   :  { %2267 = vmatpush3.bf16.msra.mxu0 %v2266_v50  ;;  %v769_v50 = vld [vmem:[%s3365_s9 + $0x50] sm:$0xff] }
  0xa8   :  { %2268 = vmatprep.subr.bf16.mxu0 %v2707_v0 }
  0xab   :  { %2270 = vmatpush3.bf16.msra.mxu0 %v2269_v53  ;;  %v2300_v53 = vpack.c.bf16 %v769_v50, %v759_v48  ;;  %v2314_v48 = vpack.c.bf16 %v778_v41, %v768_v40  ;;  %v1264_v50 = vld [vmem:[#allocation11 + $0xb8] sm:$0xff]  ;;  %v1298_v40 = vld [vmem:[#allocation11 + $0x1c8] sm:$0xff] }
  0xac   :  { %2271 = vmatprep.subr.bf16.mxu0 %v2707_v0 }
  0xaf   :  { %2273 = vmatpush3.bf16.msra.mxu0 %v2272_v56  ;;  %v765_v56 = vld [vmem:[%s3365_s9 + $0x30] sm:$0xff] }
  0xb0   :  { %2274 = vmatprep.subr.bf16.mxu0 %v2707_v0 }
  0xb3   :  { %2276 = vmatpush3.bf16.msra.mxu0 %v2275_v6  ;;  %v779_v6 = vld [vmem:[%s3365_s9 + $0xa0] sm:$0xf] }
  0xb4   :  { %2299 = vmatprep.subr.bf16.mxu0 %v2298_v49  ;;  %v1263_v49 = vld [vmem:[#allocation11 + $0xb0] sm:$0xff] }
 0x175   :  { %v306_v63 = vpop.f32.mrb[0].mxu0 }
 0x176   :  { %v307_v2 = vadd.f32 %v306_v63, %v230_v62  ;;  %v2147_v3 = vpop.f32.mrb[1].mxu0  ;;  %v2312_v63 = vpack.c.bf16 %v775_v57, %v765_v56  ;;  %v1273_v56 = vld [vmem:[#allocation11 + $0x100] sm:$0xff]  ;;  %v1274_v57 = vld [vmem:[#allocation11 + $0x108] sm:$0xff] }
 0x177   :  { %v780_v3 = vld [vmem:[%s3365_s9 + $0xa8] sm:$0xf] }
 0x178   :  { %2155 = vmatmul.mubr.msk.f32.vlgmr.msra.gmra.mrb[0].mxu1 %vm232_vm3, %v307_v2 }
 0x179   :  { %2186 = vmatprep.mubr.msk.f32.mxu1 %vm2708_vm0, %v2709_v1  ;;  %2279 = vmatpush3.bf16.msra.mxu1 %v2278_v9  ;;  %v785_v9 = vld [vmem:[%s3365_s9 + $0xd0] sm:$0xf] }
 0x17a   :  { %2184 = vmatprep.subr.mxu1 %v2709_v1 }
 0x17d   :  { %2185 = vmatpush3.msk.msra.mxu1 %vm236_vm1, %v1905_v15  ;;  %v1924_v15 = vld [vmem:[#allocation10 + $0x1] ss:$0 sm:$0xff] }
 0x17e   :  { %2280 = vmatprep.subr.bf16.mxu1 %v2707_v0 }
 0x24b   :  { %v392_v11 = vpop.f32.mrb[0].mxu1 }
 0x24c   :  { %v393_v12 = vadd.f32 %v1898_v10, %v392_v11  ;;  %v2156_v13 = vpop.f32.mrb[1].mxu1  ;;  %v1257_v10 = vld [vmem:[#allocation11 + $0x80] sm:$0xff]  ;;  %v1258_v11 = vld [vmem:[#allocation11 + $0x88] sm:$0xff] }
 0x24d   :  { %v761_v13 = vld [vmem:[%s3365_s9 + $0x10] sm:$0xff] }
 0x24e   :  { %v396_v14 = vmax.f32 %v393_v12, 0.0  ;;  %v2318_v12 = vpack.c.bf16 %v1258_v11, %v1257_v10 }
 0x250   :  { %2178 = vmatmul.mubr.msk.f32.vlgmr.msra.gmra.mrb[2].mxu0 %vm414_vm4, %v396_v14  ;;  %v771_v14 = vld [vmem:[%s3365_s9 + $0x60] sm:$0xff] }
 0x251   :  { %940 = vmatprep.mubr.f32.mxu0 %v2709_v1  ;;  %2301 = vmatpush1.bf16.msra.mxu0 %v2300_v53  ;;  %v1289_v53 = vld [vmem:[#allocation11 + $0x180] sm:$0xff] }
 0x252   :  { %1926 = vmatprep.subr.msk.mxu0 %vm236_vm1, %v780_v3  ;;  %v1265_v3 = vld [vmem:[#allocation11 + $0xc0] sm:$0xff] }
 0x255   :  { %1927 = vmatpush1.msk.msra.mxu0 %vm236_vm1, %v779_v6 }
 0x256   :  { %2303 = vmatprep.subr.bf16.mxu0 %v2302_v8  ;;  %v1275_v8 = vld [vmem:[#allocation11 + $0x110] sm:$0xff] }
 0x323   :  { %v484_v19 = vpop.f32.mrb[2].mxu0 }
 0x324   :  { %v485_v20 = vadd.f32 %v1901_v16, %v484_v19  ;;  %v2179_v21 = vpop.f32.mrb[3].mxu0  ;;  %v1241_v16 = vld [vmem:[#allocation11] sm:$0xff]  ;;  %v1260_v19 = vld [vmem:[#allocation11 + $0x98] sm:$0xff] }
 0x325   :  { %v2304_v21 = vpack.c.bf16 %v771_v14, %v761_v13  ;;  %v2322_v28 = vpack.c.bf16 %v1260_v19, %v1259_v18  ;;  %v2334_v13 = vpack.c.bf16 %v1266_v4, %v1265_v3  ;;  %v1249_v14 = vld [vmem:[#allocation11 + $0x40] sm:$0xff]  ;;  %v1268_v18 = vld [vmem:[#allocation11 + $0xd8] sm:$0xff] }
 0x326   :  { %v488_v23 = vmul.f32 8.0, %v485_v20 }
 0x328   :  { %2187 = vmatmul.mubr.msk.f32.vlgmr.msra.gmra.mrb[2].mxu1 %vm232_vm3, %v488_v23 }
 0x329   :  { %2282 = vmatpush3.bf16.msra.mxu1 %v2281_v22  ;;  %2195 = vmatprep.mubr.msk.f32.mxu1 %vm2708_vm0, %v2709_v1 }
 0x32a   :  { %2193 = vmatprep.subr.mxu1 %v2709_v1 }
 0x32d   :  { %2194 = vmatpush3.msk.msra.mxu1 %vm236_vm1, %v1910_v24  ;;  %v2320_v24 = vpack.c.bf16 %v1242_v17, %v1241_v16  ;;  %v1294_v16 = vld [vmem:[#allocation11 + $0x1a8] sm:$0xff]  ;;  %v1267_v17 = vld [vmem:[#allocation11 + $0xd0] sm:$0xff] }
 0x32e   :  { %2283 = vmatprep.subr.bf16.mxu1 %v2707_v0 }
 0x3fb   :  { %v574_v30 = vpop.f32.mrb[2].mxu1 }
 0x3fc   :  { %v575_v32 = vadd.f32 %v574_v30, %v500_v27  ;;  %v2188_v33 = vpop.f32.mrb[3].mxu1  ;;  %v774_v27 = vld [vmem:[%s3365_s9 + $0x78] sm:$0xff]  ;;  %v773_v30 = vld [vmem:[%s3365_s9 + $0x70] sm:$0xff] }
 0x3fd   :  { %v781_v33 = vld [vmem:[%s3365_s9 + $0xb0] sm:$0xf]  ;;  %v2306_v34 = vpack.c.bf16 %v774_v27, %v764_v26  ;;  %v2308_v37 = vpack.c.bf16 %v773_v30, %v763_v29  ;;  %v2338_v26 = vpack.c.bf16 %v1268_v18, %v1267_v17  ;;  %v1251_v27 = vld [vmem:[#allocation11 + $0x50] sm:$0xff]  ;;  %v1296_v29 = vld [vmem:[#allocation11 + $0x1b8] sm:$0xff]  ;;  %v799_v18 = vsub.s32 1, %v3031_v58 }
 0x3fe   :  { %2196 = vmatmul.mubr.msk.f32.vlgmr.msra.gmra.mrb[4].mxu1 %vm232_vm3, %v575_v32  ;;  %v1244_v32 = vld [vmem:[#allocation11 + $0x18] sm:$0xff]  ;;  %v1269_v30 = vld [vmem:[#allocation11 + $0xe0] sm:$0xff] }
 0x3ff   :  { %2285 = vmatpush3.bf16.msra.mxu1 %v2284_v31  ;;  %2218 = vmatprep.mubr.msk.f32.mxu1 %vm2708_vm0, %v2709_v1  ;;  %v1243_v31 = vld [vmem:[#allocation11 + $0x10] sm:$0xff]  ;;  %v3233_v17 = vld [vmem:[%s3366_s10] sm:$0xff] }
 0x400   :  { %2286 = vmatprep.subr.bf16.mxu1 %v2707_v0  ;;  %v2324_v38 = vpack.c.bf16 %v1244_v32, %v1243_v31  ;;  %v1270_v31 = vld [vmem:[#allocation11 + $0xe8] sm:$0xff] }
 0x403   :  { %2288 = vmatpush3.bf16.msra.mxu1 %v2287_v36  ;;  %v1262_v36 = vld [vmem:[#allocation11 + $0xa8] sm:$0xff] }
 0x404   :  { %2289 = vmatprep.subr.bf16.mxu1 %v2707_v0 }
 0x407   :  { %2291 = vmatpush3.bf16.msra.mxu1 %v2290_v39  ;;  %v784_v39 = vld [vmem:[%s3365_s9 + $0xc8] sm:$0xf] }
 0x408   :  { %2292 = vmatprep.subr.bf16.mxu1 %v2707_v0 }
 0x40b   :  { %2294 = vmatpush3.bf16.msra.mxu1 %v2293_v42  ;;  %v2326_v42 = vpack.c.bf16 %v1262_v36, %v1261_v35  ;;  %v1280_v35 = vld [vmem:[#allocation11 + $0x138] sm:$0xff]  ;;  %v2342_v36 = vpack.c.bf16 %v1270_v31, %v1269_v30  ;;  %v1305_v30 = vld [vmem:[#allocation11 + $0x200] sm:$0xff]  ;;  %v1306_v31 = vld [vmem:[#allocation11 + $0x208] sm:$0xff] }
 0x40c   :  { %2295 = vmatprep.subr.bf16.mxu1 %v2707_v0 }
 0x40f   :  { %2297 = vmatpush3.bf16.msra.mxu1 %v2296_v45  ;;  %v1245_v45 = vld [vmem:[#allocation11 + $0x20] sm:$0xff] }
 0x410   :  { %2311 = vmatprep.subr.bf16.mxu1 %v2310_v54  ;;  %v2328_v54 = vpack.c.bf16 %v1246_v46, %v1245_v45  ;;  %v1282_v45 = vld [vmem:[#allocation11 + $0x148] sm:$0xff]  ;;  %v1299_v46 = vld [vmem:[#allocation11 + $0x1d0] sm:$0xff] }
 0x4d1   :  { %v662_v59 = vpop.f32.mrb[4].mxu1 }
 0x4d2   :  { %v663_v60 = vadd.f32 %v1911_v55, %v662_v59  ;;  %v2197_v62 = vpop.f32.mrb[5].mxu1  ;;  %v1290_v55 = vld [vmem:[#allocation11 + $0x188] sm:$0xff]  ;;  %v2330_v59 = vpack.c.bf16 %v1264_v50, %v1263_v49  ;;  %v1283_v50 = vld [vmem:[#allocation11 + $0x150] sm:$0xff] }
 0x4d3   :  { %v1247_v62 = vld [vmem:[#allocation11 + $0x30] sm:$0xff]  ;;  %v2350_v6 = vpack.c.bf16 %v1290_v55, %v1289_v53 }
 0x4d4   :  { %v666_v2 = vmax.f32 %v663_v60, 0.0  ;;  %v1291_v60 = vld [vmem:[#allocation11 + $0x190] sm:$0xff] }
 0x4d5   :  { %v1271_v53 = vld [vmem:[#allocation11 + $0xf0] sm:$0xff] }
 0x4d6   :  { %2219 = vmatmul.mubr.msk.f32.vlgmr.msra.gmra.mrb[6].mxu1 %vm414_vm4, %v666_v2  ;;  %v1292_v2 = vld [vmem:[#allocation11 + $0x198] sm:$0xff] }
 0x4d7   :  { %2313 = vmatpush1.bf16.msra.mxu1 %v2312_v63  ;;  %1153 = vmatprep.mubr.f32.mxu1 %v2709_v1  ;;  %v1248_v63 = vld [vmem:[#allocation11 + $0x38] sm:$0xff]  ;;  %v2354_v11 = vpack.c.bf16 %v1292_v2, %v1291_v60  ;;  %v1286_v2 = vld [vmem:[#allocation11 + $0x168] sm:$0xff] }
 0x4d8   :  { %1935 = vmatprep.subr.msk.mxu1 %vm236_vm1, %v786_v7  ;;  %v2352_v7 = vpack.c.bf16 %v1274_v57, %v1273_v56  ;;  %v2332_v10 = vpack.c.bf16 %v1248_v63, %v1247_v62  ;;  %v1255_v56 = vld [vmem:[#allocation11 + $0x70] sm:$0xff]  ;;  %v1256_v57 = vld [vmem:[#allocation11 + $0x78] sm:$0xff]  ;;  %v1302_v62 = vld [vmem:[#allocation11 + $0x1e8] sm:$0xff] }
 0x4d9   :  { %v2348_v60 = vpack.c.bf16 %v1256_v57, %v1255_v56  ;;  %v1285_v63 = vld [vmem:[#allocation11 + $0x160] sm:$0xff] }
 0x4da   :  { %v2376_v4 = vpack.c.bf16 %v1286_v2, %v1285_v63  ;;  %v1309_v57 = vld [vmem:[#allocation11 + $0x220] sm:$0xff]  ;;  %v1327_v2 = vld [vmem:[#allocation11 + $0x2b0] sm:$0xff] }
 0x4db   :  { %1936 = vmatpush1.msk.msra.mxu1 %vm236_vm1, %v785_v9  ;;  %v1276_v9 = vld [vmem:[#allocation11 + $0x118] sm:$0xff] }
 0x4dc   :  { %2319 = vmatprep.subr.bf16.mxu1 %v2318_v12  ;;  %v1293_v12 = vld [vmem:[#allocation11 + $0x1a0] sm:$0xff]  ;;  %v2356_v19 = vpack.c.bf16 %v1276_v9, %v1275_v8  ;;  %v1303_v8 = vld [vmem:[#allocation11 + $0x1f0] sm:$0xff]  ;;  %v1304_v9 = vld [vmem:[#allocation11 + $0x1f8] sm:$0xff] }
 0x5a9   :  { %v755_v20 = vpop.f32.mrb[6].mxu1 }
 0x5aa   :  { %v3167_v22 = vadd.f32 %v1924_v15, %v755_v20  ;;  %v2220_v23 = vpop.f32.mrb[7].mxu1  ;;  %v1250_v15 = vld [vmem:[#allocation11 + $0x48] sm:$0xff]  ;;  %v1277_v20 = vld [vmem:[#allocation11 + $0x120] sm:$0xff] }
 0x5ab   :  { %v2336_v23 = vpack.c.bf16 %v1250_v15, %v1249_v14  ;;  %v1353_v14 = vld [vmem:[#allocation11 + $0x380] sm:$0xff]  ;;  %v1354_v15 = vld [vmem:[#allocation11 + $0x388] sm:$0xff] }
 0x5ac   :  { %1928 = vmatmul.mubr.msk.f32.vlgmr.msra.gmra.mrb[4].mxu0 %vm232_vm3, %v3167_v22  ;;  %1937 = vmatmul.mubr.msk.f32.vlgmr.msra.gmra.mrb[8].mxu1 %vm232_vm3, %v3167_v22 }
 0x5ad   :  { %2305 = vmatpush1.bf16.msra.mxu0 %v2304_v21  ;;  %1011 = vmatprep.mubr.f32.mxu0 %v2709_v1  ;;  %v1278_v21 = vld [vmem:[#allocation11 + $0x128] sm:$0xff] }
 0x5ae   :  { %1929 = vmatprep.subr.msk.mxu0 %vm236_vm1, %v782_v25  ;;  %2321 = vmatpush3.bf16.msra.mxu1 %v2320_v24  ;;  %v2358_v24 = vpack.c.bf16 %v1294_v16, %v1293_v12  ;;  %v1295_v25 = vld [vmem:[#allocation11 + $0x1b0] sm:$0xff]  ;;  %v2360_v32 = vpack.c.bf16 %v1278_v21, %v1277_v20  ;;  %v1288_v12 = vld [vmem:[#allocation11 + $0x178] sm:$0xff]  ;;  %v2414_v16 = vpack.c.bf16 %v1354_v15, %v1353_v14  ;;  %v803_v21 = vsub.s32 2, %v3031_v58 }
 0x5af   :  { %2323 = vmatprep.subr.bf16.mxu1 %v2322_v28  ;;  %v1252_v28 = vld [vmem:[#allocation11 + $0x58] sm:$0xff]  ;;  %v800_v20 = vrot.slane %v3233_v17, %v799_v18  ;;  %v1311_v15 = vld [vmem:[#allocation11 + $0x230] sm:$0xff] }
 0x5b1   :  { %1930 = vmatpush1.msk.msra.mxu0 %vm236_vm1, %v781_v33  ;;  %v2340_v33 = vpack.c.bf16 %v1252_v28, %v1251_v27 }
 0x5b2   :  { %1931 = vmatmul.mubr.msk.f32.vlgmr.msra.gmra.mrb[6].mxu0 %vm232_vm3, %v3167_v22  ;;  %2307 = vmatprep.subr.bf16.mxu0 %v2306_v34  ;;  %v2362_v34 = vpack.c.bf16 %v1296_v29, %v1295_v25  ;;  %v823_v25 = vsub.s32 7, %v3031_v58 }
 0x5b3   :  { %2309 = vmatpush1.bf16.msra.mxu0 %v2308_v37  ;;  %1082 = vmatprep.mubr.f32.mxu0 %v2709_v1  ;;  %v1253_v37 = vld [vmem:[#allocation11 + $0x60] sm:$0xff] }
 0x5b4   :  { %1932 = vmatprep.subr.msk.mxu0 %vm236_vm1, %v784_v39  ;;  %2325 = vmatpush3.bf16.msra.mxu1 %v2324_v38  ;;  %v1254_v38 = vld [vmem:[#allocation11 + $0x68] sm:$0xff]  ;;  %v1297_v39 = vld [vmem:[#allocation11 + $0x1c0] sm:$0xff] }
 0x5b5   :  { %2327 = vmatprep.subr.bf16.mxu1 %v2326_v42  ;;  %v2344_v42 = vpack.c.bf16 %v1254_v38, %v1253_v37  ;;  %v2366_v43 = vpack.c.bf16 %v1298_v40, %v1297_v39  ;;  %v2384_v38 = vpack.c.bf16 %v1306_v31, %v1305_v30  ;;  %v1359_v30 = vld [vmem:[#allocation11 + $0x3b0] sm:$0xff]  ;;  %v1360_v31 = vld [vmem:[#allocation11 + $0x3b8] sm:$0xff] }
 0x5b7   :  { %1933 = vmatpush1.msk.msra.mxu0 %vm236_vm1, %v783_v47  ;;  %v1300_v47 = vld [vmem:[#allocation11 + $0x1d8] sm:$0xff] }
 0x5b8   :  { %1934 = vmatmul.mubr.msk.f32.vlgmr.msra.gmra.mrb[8].mxu0 %vm232_vm3, %v3167_v22  ;;  %2315 = vmatprep.subr.bf16.mxu0 %v2314_v48  ;;  %v2368_v48 = vpack.c.bf16 %v1282_v45, %v1281_v44  ;;  %v2370_v49 = vpack.c.bf16 %v1300_v47, %v1299_v46  ;;  %v815_v44 = vsub.s32 5, %v3031_v58  ;;  %v1325_v45 = vld [vmem:[#allocation11 + $0x2a0] sm:$0xff]  ;;  %v1326_v46 = vld [vmem:[#allocation11 + $0x2a8] sm:$0xff] }
 0x5b9   :  { %2317 = vmatpush1.bf16.msra.mxu0 %v2316_v51  ;;  %1224 = vmatprep.mubr.f32.mxu0 %v2709_v1  ;;  %v1284_v51 = vld [vmem:[#allocation11 + $0x158] sm:$0xff]  ;;  %v2390_v56 = vpack.c.bf16 %v1326_v46, %v1325_v45  ;;  %v1315_v46 = vld [vmem:[#allocation11 + $0x250] sm:$0xff] }
 0x5ba   :  { %1938 = vmatprep.subr.msk.mxu0 %vm236_vm1, %v788_v52  ;;  %2329 = vmatpush3.bf16.msra.mxu1 %v2328_v54  ;;  %v2372_v52 = vpack.c.bf16 %v1284_v51, %v1283_v50  ;;  %v1272_v54 = vld [vmem:[#allocation11 + $0xf8] sm:$0xff]  ;;  %v1338_v50 = vld [vmem:[#allocation11 + $0x308] sm:$0xff] }
 0x5bb   :  { %2331 = vmatprep.subr.bf16.mxu1 %v2330_v59  ;;  %v2346_v55 = vpack.c.bf16 %v1272_v54, %v1271_v53  ;;  %v1301_v59 = vld [vmem:[#allocation11 + $0x1e0] sm:$0xff]  ;;  %v1355_v54 = vld [vmem:[#allocation11 + $0x390] sm:$0xff] }
 0x5bc   :  { %v2374_v3 = vpack.c.bf16 %v1302_v62, %v1301_v59  ;;  %v1310_v59 = vld [vmem:[#allocation11 + $0x228] sm:$0xff]  ;;  %v816_v62 = vrot.slane %v3233_v17, %v815_v44 }
 0x5bd   :  { %1939 = vmatpush1.msk.msra.mxu0 %vm236_vm1, %v787_v5  ;;  %v1321_v5 = vld [vmem:[#allocation11 + $0x280] sm:$0xff]  ;;  %v1362_v44 = vld [vmem:[#allocation11 + $0x3c8] sm:$0xff] }
 0x5be   :  { %1940 = vmatmul.mubr.msk.f32.vlgmr.msra.gmra.mrb[10].mxu0 %vm232_vm3, %v3167_v22  ;;  %2351 = vmatprep.subr.bf16.mxu0 %v2350_v6  ;;  %v1279_v22 = vld [vmem:[#allocation11 + $0x130] sm:$0xff]  ;;  %v1322_v6 = vld [vmem:[#allocation11 + $0x288] sm:$0xff] }
 0x5bf   :  { %2353 = vmatpush3.bf16.msra.mxu0 %v2352_v7  ;;  %2333 = vmatpush3.bf16.msra.mxu1 %v2332_v10  ;;  %v2364_v41 = vpack.c.bf16 %v1280_v35, %v1279_v22  ;;  %v2382_v7 = vpack.c.bf16 %v1322_v6, %v1321_v5  ;;  %v2378_v10 = vpack.c.bf16 %v1304_v9, %v1303_v8  ;;  %v1323_v22 = vld [vmem:[#allocation11 + $0x290] sm:$0xff] }
 0x5c0   :  { %2355 = vmatprep.subr.bf16.mxu0 %v2354_v11  ;;  %2335 = vmatprep.subr.bf16.mxu1 %v2334_v13  ;;  %v1287_v11 = vld [vmem:[#allocation11 + $0x170] sm:$0xff] }
 0x5c1   :  { %v2380_v13 = vpack.c.bf16 %v1288_v12, %v1287_v11  ;;  %v1339_v6 = vld [vmem:[#allocation11 + $0x310] sm:$0xff]  ;;  %v1357_v11 = vld [vmem:[#allocation11 + $0x3a0] sm:$0xff]  ;;  %v1358_v12 = vld [vmem:[#allocation11 + $0x3a8] sm:$0xff] }
 0x5c3   :  { %2357 = vmatpush3.bf16.msra.mxu0 %v2356_v19  ;;  %2337 = vmatpush3.bf16.msra.mxu1 %v2336_v23  ;;  %v796_v19 = vrot.slane %v3233_v17, %v3034_v61 }
 0x5c4   :  { %2359 = vmatprep.subr.bf16.mxu0 %v2358_v24  ;;  %2339 = vmatprep.subr.bf16.mxu1 %v2338_v26  ;;  %v807_v26 = vsub.s32 3, %v3031_v58 }
 0x5c6   :  { %v808_v37 = vrot.slane %v3233_v17, %v807_v26  ;;  %v1341_v26 = vld [vmem:[#allocation11 + $0x320] sm:$0xff] }
 0x5c7   :  { %2361 = vmatpush3.bf16.msra.mxu0 %v2360_v32  ;;  %2341 = vmatpush3.bf16.msra.mxu1 %v2340_v33  ;;  %v1324_v33 = vld [vmem:[#allocation11 + $0x298] sm:$0xff] }
 0x5c8   :  { %2363 = vmatprep.subr.bf16.mxu0 %v2362_v34  ;;  %2343 = vmatprep.subr.bf16.mxu1 %v2342_v36  ;;  %v804_v34 = vrot.slane %v3233_v17, %v803_v21  ;;  %v824_v36 = vrot.slane %v3233_v17, %v823_v25  ;;  %v2386_v40 = vpack.c.bf16 %v1324_v33, %v1323_v22  ;;  %v1329_v21 = vld [vmem:[#allocation11 + $0x2c0] sm:$0xff]  ;;  %v1314_v33 = vld [vmem:[#allocation11 + $0x248] sm:$0xff] }
 0x5c9   :  { %v2422_v25 = vpack.c.bf16 %v1358_v12, %v1357_v11  ;;  %v1313_v22 = vld [vmem:[#allocation11 + $0x240] sm:$0xff]  ;;  %v1366_v11 = vld [vmem:[#allocation11 + $0x3e8] sm:$0xff] }
 0x5cb   :  { %2365 = vmatpush3.bf16.msra.mxu0 %v2364_v41  ;;  %2345 = vmatpush3.bf16.msra.mxu1 %v2344_v42  ;;  %v1307_v41 = vld [vmem:[#allocation11 + $0x210] sm:$0xff]  ;;  %v1308_v42 = vld [vmem:[#allocation11 + $0x218] sm:$0xff] }
 0x5cc   :  { %2367 = vmatprep.subr.bf16.mxu0 %v2366_v43  ;;  %2347 = vmatprep.subr.bf16.mxu1 %v2346_v55  ;;  %v2388_v53 = vpack.c.bf16 %v1308_v42, %v1307_v41  ;;  %v1356_v55 = vld [vmem:[#allocation11 + $0x398] sm:$0xff]  ;;  %v2400_v42 = vpack.c.bf16 %v1314_v33, %v1313_v22  ;;  %v1351_v33 = vld [vmem:[#allocation11 + $0x370] sm:$0xff] }
 0x5cd   :  { %v2418_v5 = vpack.c.bf16 %v1356_v55, %v1355_v54  ;;  %v1344_v41 = vld [vmem:[#allocation11 + $0x338] sm:$0xff]  ;;  %v1363_v55 = vld [vmem:[#allocation11 + $0x3d0] sm:$0xff] }
 0x5cf   :  { %2369 = vmatpush3.bf16.msra.mxu0 %v2368_v48  ;;  %2349 = vmatpush3.bf16.msra.mxu1 %v2348_v60 }
 0x5d0   :  { %2371 = vmatprep.subr.bf16.mxu0 %v2370_v49  ;;  %2383 = vmatprep.subr.bf16.mxu1 %v2382_v7  ;;  %v1337_v49 = vld [vmem:[#allocation11 + $0x300] sm:$0xff]  ;;  %v1340_v7 = vld [vmem:[#allocation11 + $0x318] sm:$0xff] }
 0x5d1   :  { %v2416_v63 = vpack.c.bf16 %v1338_v50, %v1337_v49  ;;  %v1333_v49 = vld [vmem:[#allocation11 + $0x2e0] sm:$0xff]  ;;  %v1334_v50 = vld [vmem:[#allocation11 + $0x2e8] sm:$0xff] }
 0x5d3   :  { %2373 = vmatpush3.bf16.msra.mxu0 %v2372_v52 }
 0x5d4   :  { %2375 = vmatprep.subr.bf16.mxu0 %v2374_v3  ;;  %v1328_v3 = vld [vmem:[#allocation11 + $0x2b8] sm:$0xff] }
 0x5d5   :  { %v2394_v14 = vpack.c.bf16 %v1328_v3, %v1327_v2  ;;  %v1335_v2 = vld [vmem:[#allocation11 + $0x2f0] sm:$0xff]  ;;  %v1336_v3 = vld [vmem:[#allocation11 + $0x2f8] sm:$0xff] }
 0x5d7   :  { %2377 = vmatpush3.bf16.msra.mxu0 %v2376_v4 }
 0x5d8   :  { %2379 = vmatprep.subr.bf16.mxu0 %v2378_v10  ;;  %v2392_v10 = vpack.c.bf16 %v1310_v59, %v1309_v57  ;;  %v811_v57 = vsub.s32 4, %v3031_v58  ;;  %v2406_v59 = vpack.c.bf16 %v1334_v50, %v1333_v49  ;;  %v1378_v49 = vld [vmem:[#allocation11 + $0x448] sm:$0xff] }
 0x5da   :  { %v812_v12 = vrot.slane %v3233_v17, %v811_v57  ;;  %v1384_v57 = vld [vmem:[#allocation11 + $0x478] sm:$0xff] }
 0x5db   :  { %2381 = vmatpush3.bf16.msra.mxu0 %v2380_v13 }
 0x5dc   :  { %2415 = vmatprep.subr.bf16.mxu0 %v2414_v16  ;;  %v1312_v16 = vld [vmem:[#allocation11 + $0x238] sm:$0xff] }
 0x67f   :  { %v942_v23 = vpop.f32.mrb[4].mxu0  ;;  %v3242_v24 = vpop.f32.mrb[8].mxu1 }
 0x680   :  { %v943_v27 = vadd.f32 %v942_v23, %v796_v19  ;;  %v944_v28 = vpop.f32.mrb[5].mxu0  ;;  %v1157_v29 = vpop.f32.mrb[9].mxu1  ;;  %v1330_v23 = vld [vmem:[#allocation11 + $0x2c8] sm:$0xff] }
 0x681   :  { %v945_v32 = vadd.f32 %v944_v28, %v800_v20  ;;  %v1158_v51 = vadd.f32 %v1157_v29, %v824_v36  ;;  %v2420_v20 = vpack.c.bf16 %v1340_v7, %v1339_v6  ;;  %v2396_v29 = vpack.c.bf16 %v1312_v16, %v1311_v15  ;;  %v1331_v36 = vld [vmem:[#allocation11 + $0x2d0] sm:$0xff]  ;;  %v1348_v7 = vld [vmem:[#allocation11 + $0x358] sm:$0xff] }
 0x682   :  { %v1231_v39 = vmax.f32 %v943_v27, 0.0  ;;  %v1342_v27 = vld [vmem:[#allocation11 + $0x328] sm:$0xff]  ;;  %v1347_v6 = vld [vmem:[#allocation11 + $0x350] sm:$0xff]  ;;  %v1320_v15 = vld [vmem:[#allocation11 + $0x278] sm:$0xff] }
 0x683   :  { %v1232_v35 = vmax.f32 %v945_v32, 0.0  ;;  %v1238_v8 = vmax.f32 %v1158_v51, 0.0  ;;  %v2398_v32 = vpack.c.bf16 %v1330_v23, %v1329_v21  ;;  %v1349_v23 = vld [vmem:[#allocation11 + $0x360] sm:$0xff] }
 0x685   :  { %v1013_v43 = vpop.f32.mrb[6].mxu0  ;;  %1466 = vmatprep.mubr.f32.mxu1 %v1232_v35  ;;  %v2424_v35 = vpack.c.bf16 %v1342_v27, %v1341_v26  ;;  %v1367_v27 = vld [vmem:[#allocation11 + $0x3f0] sm:$0xff] }
 0x686   :  { %v1014_v47 = vadd.f32 %v1013_v43, %v804_v34  ;;  %v1015_v48 = vpop.f32.mrb[7].mxu0  ;;  %1467 = vmatmul.mubr.f32.vlgmr.msra.gmra.mrb[10].mxu1 %v1231_v39  ;;  %v2426_v39 = vpack.c.bf16 %v1360_v31, %v1359_v30  ;;  %v1361_v43 = vld [vmem:[#allocation11 + $0x3c0] sm:$0xff]  ;;  %v1370_v31 = vld [vmem:[#allocation11 + $0x408] sm:$0xff] }
 0x687   :  { %v1016_v52 = vadd.f32 %v1015_v48, %v808_v37  ;;  %2385 = vmatpush3.bf16.msra.mxu1 %v2384_v38  ;;  %v1332_v37 = vld [vmem:[#allocation11 + $0x2d8] sm:$0xff]  ;;  %v2430_v51 = vpack.c.bf16 %v1362_v44, %v1361_v43  ;;  %v1369_v30 = vld [vmem:[#allocation11 + $0x400] sm:$0xff]  ;;  %v1374_v43 = vld [vmem:[#allocation11 + $0x428] sm:$0xff] }
 0x688   :  { %2387 = vmatprep.subr.bf16.mxu1 %v2386_v40  ;;  %v1233_v4 = vmax.f32 %v1014_v47, 0.0  ;;  %v1343_v40 = vld [vmem:[#allocation11 + $0x330] sm:$0xff]  ;;  %v2402_v45 = vpack.c.bf16 %v1332_v37, %v1331_v36  ;;  %v1316_v47 = vld [vmem:[#allocation11 + $0x258] sm:$0xff]  ;;  %v2447_v36 = vpack.c.bf16 %v1370_v31, %v1369_v30 }
 0x689   :  { %v1234_v60 = vmax.f32 %v1016_v52, 0.0  ;;  %v2428_v48 = vpack.c.bf16 %v1344_v41, %v1343_v40  ;;  %v1345_v52 = vld [vmem:[#allocation11 + $0x340] sm:$0xff]  ;;  %v2404_v54 = vpack.c.bf16 %v1316_v47, %v1315_v46  ;;  %v1375_v46 = vld [vmem:[#allocation11 + $0x430] sm:$0xff] }
 0x68a   :  { %v1764_v30 = vld [vmem:[%s3369_s13 + $0x58] sm:$0xff] }
 0x68b   :  { %v3251_v9 = vpop.f32.mrb[8].mxu0  ;;  %1536 = vmatprep.mubr.f32.mxu0 %v1234_v60  ;;  %2389 = vmatpush3.bf16.msra.mxu1 %v2388_v53  ;;  %v1346_v53 = vld [vmem:[#allocation11 + $0x348] sm:$0xff]  ;;  %v1317_v60 = vld [vmem:[#allocation11 + $0x260] sm:$0xff] }
 0x68c   :  { %v1086_v13 = vpop.f32.mrb[9].mxu0  ;;  %1537 = vmatmul.mubr.f32.vlgmr.msra.gmra.mrb[12].mxu0 %v1233_v4  ;;  %2391 = vmatprep.subr.bf16.mxu1 %v2390_v56  ;;  %v1364_v56 = vld [vmem:[#allocation11 + $0x3d8] sm:$0xff]  ;;  %v3261_v4 = vld [vmem:[%s3366_s10 + $0x8] sm:$0x3] }
 0x68d   :  { %v1087_v19 = vadd.f32 %v1086_v13, %v816_v62  ;;  %2417 = vmatpush3.bf16.msra.mxu0 %v2416_v63  ;;  %1676 = vmatprep.mubr.f32.mxu0 %v1238_v8  ;;  %v1318_v62 = vld [vmem:[#allocation11 + $0x268] sm:$0xff]  ;;  %v2432_v63 = vpack.c.bf16 %v1346_v53, %v1345_v52  ;;  %v2410_v13 = vpack.c.bf16 %v1336_v3, %v1335_v2  ;;  %v1380_v52 = vld [vmem:[#allocation11 + $0x458] sm:$0xff]  ;;  %v1387_v2 = vld [vmem:[#allocation11 + $0x490] sm:$0xff] }
 0x68e   :  { %2419 = vmatprep.subr.bf16.mxu0 %v2418_v5  ;;  %v2434_v5 = vpack.c.bf16 %v1364_v56, %v1363_v55  ;;  %v2408_v8 = vpack.c.bf16 %v1318_v62, %v1317_v60  ;;  %v832_v16 = vrot.slane %v3261_v4, %v799_v18  ;;  %v1382_v55 = vld [vmem:[#allocation11 + $0x468] sm:$0xff]  ;;  %v1383_v56 = vld [vmem:[#allocation11 + $0x470] sm:$0xff]  ;;  %v1385_v60 = vld [vmem:[#allocation11 + $0x480] sm:$0xff] }
 0x68f   :  { %v1236_v28 = vmax.f32 %v1087_v19, 0.0  ;;  %2393 = vmatpush3.bf16.msra.mxu1 %v2392_v10  ;;  %v1365_v10 = vld [vmem:[#allocation11 + $0x3e0] sm:$0xff]  ;;  %v2436_v19 = vpack.c.bf16 %v1348_v7, %v1347_v6  ;;  %v1386_v62 = vld [vmem:[#allocation11 + $0x488] sm:$0xff]  ;;  %v1388_v3 = vld [vmem:[#allocation11 + $0x498] sm:$0xff]  ;;  %v828_v6 = vrot.slane %v3261_v4, %v3034_v61 }
 0x690   :  { %2395 = vmatprep.subr.bf16.mxu1 %v2394_v14  ;;  %v1319_v14 = vld [vmem:[#allocation11 + $0x270] sm:$0xff]  ;;  %v2438_v21 = vpack.c.bf16 %v1366_v11, %v1365_v10  ;;  %v1389_v7 = vld [vmem:[#allocation11 + $0x4a0] sm:$0xff]  ;;  %v1755_v4 = vld [vmem:[%s3369_s13 + $0x10] sm:$0xff] }
 0x691   :  { %2421 = vmatpush3.bf16.msra.mxu0 %v2420_v20  ;;  %v3253_v34 = vpop.f32.mrb[10].mxu0  ;;  %1606 = vmatprep.mubr.f32.mxu1 %v1236_v28  ;;  %v819_v20 = vsub.s32 6, %v3031_v58  ;;  %v2412_v26 = vpack.c.bf16 %v1320_v15, %v1319_v14  ;;  %v1368_v28 = vld [vmem:[#allocation11 + $0x3f8] sm:$0xff]  ;;  %v1754_v61 = vld [vmem:[%s3369_s13 + $0x8] sm:$0xff] }
 0x692   :  { %v3255_v38 = vpop.f32.mrb[11].mxu0  ;;  %2423 = vmatprep.subr.bf16.mxu0 %v2422_v25  ;;  %v1350_v25 = vld [vmem:[#allocation11 + $0x368] sm:$0xff]  ;;  %v2442_v58 = vpack.c.bf16 %v1368_v28, %v1367_v27  ;;  %v1227_v11 = vadd.f32 %v3253_v34, %v828_v6  ;;  %v1756_v34 = vld [vmem:[%s3369_s13 + $0x18] sm:$0xff]  ;;  %v1762_v27 = vld [vmem:[%s3369_s13 + $0x48] sm:$0xff] }
 0x693   :  { %2397 = vmatpush3.bf16.msra.mxu1 %v2396_v29  ;;  %v1085_v29 = vadd.f32 %v3251_v9, %v812_v12  ;;  %v2440_v18 = vpack.c.bf16 %v1350_v25, %v1349_v23  ;;  %v820_v22 = vrot.slane %v3233_v17, %v819_v20  ;;  %v1371_v9 = vld [vmem:[#allocation11 + $0x410] sm:$0xff]  ;;  %v2483_v15 = vpack.c.bf16 %v1756_v34, %v1755_v4 }
 0x694   :  { %2399 = vmatprep.subr.bf16.mxu1 %v2398_v32  ;;  %v1229_v32 = vadd.f32 %v3255_v38, %v832_v16  ;;  %v1239_v12 = vmax.f32 %v1227_v11, 0.0  ;;  %v1757_v16 = vld [vmem:[%s3369_s13 + $0x20] sm:$0xff]  ;;  %v1760_v23 = vld [vmem:[%s3369_s13 + $0x38] sm:$0xff] }
 0x695   :  { %2425 = vmatpush3.bf16.msra.mxu0 %v2424_v35  ;;  %v1352_v35 = vld [vmem:[#allocation11 + $0x378] sm:$0xff]  ;;  %v1235_v37 = vmax.f32 %v1085_v29, 0.0  ;;  %v1156_v38 = vadd.f32 %v3242_v24, %v820_v22  ;;  %v1763_v29 = vld [vmem:[%s3369_s13 + $0x50] sm:$0xff] }
 0x696   :  { %2427 = vmatprep.subr.bf16.mxu0 %v2426_v39  ;;  %v1372_v39 = vld [vmem:[#allocation11 + $0x418] sm:$0xff]  ;;  %v1240_v40 = vmax.f32 %v1229_v32, 0.0  ;;  %v2444_v41 = vpack.c.bf16 %v1352_v35, %v1351_v33  ;;  %v2495_v31 = vpack.c.bf16 %v1764_v30, %v1763_v29  ;;  %v1768_v33 = vld [vmem:[%s3369_s13 + $0x78] sm:$0xff] }
 0x697   :  { %2401 = vmatpush3.bf16.msra.mxu1 %v2400_v42  ;;  %v2450_v17 = vpack.c.bf16 %v1372_v39, %v1371_v9  ;;  %v1373_v42 = vld [vmem:[#allocation11 + $0x420] sm:$0xff]  ;;  %v1237_v44 = vmax.f32 %v1156_v38, 0.0  ;;  %v1376_v24 = vld [vmem:[#allocation11 + $0x438] sm:$0xff]  ;;  %v1941_v39 = vld [vmem:[#allocation13] ss:$0 sm:$0xff] }
 0x698   :  { %2403 = vmatprep.subr.bf16.mxu1 %v2402_v45  ;;  %v2453_v45 = vpack.c.bf16 %v1374_v43, %v1373_v42  ;;  %v2456_v47 = vpack.c.bf16 %v1376_v24, %v1375_v46  ;;  %v1765_v32 = vld [vmem:[%s3369_s13 + $0x60] sm:$0xff] }
 0x699   :  { %2429 = vmatpush3.bf16.msra.mxu0 %v2428_v48  ;;  %v1377_v48 = vld [vmem:[#allocation11 + $0x440] sm:$0xff] }
 0x69a   :  { %2431 = vmatprep.subr.bf16.mxu0 %v2430_v51  ;;  %v2459_v50 = vpack.c.bf16 %v1378_v49, %v1377_v48  ;;  %v1379_v51 = vld [vmem:[#allocation11 + $0x450] sm:$0xff] }
 0x69b   :  { %2405 = vmatpush3.bf16.msra.mxu1 %v2404_v54  ;;  %v2462_v53 = vpack.c.bf16 %v1380_v52, %v1379_v51  ;;  %v1381_v54 = vld [vmem:[#allocation11 + $0x460] sm:$0xff] }
 0x69c   :  { %2407 = vmatprep.subr.bf16.mxu1 %v2406_v59  ;;  %v2468_v59 = vpack.c.bf16 %v1384_v57, %v1383_v56 }
 0x69d   :  { %2433 = vmatpush3.bf16.msra.mxu0 %v2432_v63  ;;  %v2471_v63 = vpack.c.bf16 %v1386_v62, %v1385_v60 }
 0x69e   :  { %2435 = vmatprep.subr.bf16.mxu0 %v2434_v5  ;;  %v2474_v5 = vpack.c.bf16 %v1388_v3, %v1387_v2 }
 0x69f   :  { %2409 = vmatpush3.bf16.msra.mxu1 %v2408_v8  ;;  %v1390_v8 = vld [vmem:[#allocation11 + $0x4a8] sm:$0xff] }
 0x6a0   :  { %2411 = vmatprep.subr.bf16.mxu1 %v2410_v13  ;;  %v2477_v10 = vpack.c.bf16 %v1390_v8, %v1389_v7  ;;  %v1753_v13 = vld [vmem:[%s3369_s13] sm:$0xff] }
 0x6a1   :  { %2437 = vmatpush3.bf16.msra.mxu0 %v2436_v19  ;;  %v2480_v14 = vpack.c.bf16 %v1754_v61, %v1753_v13  ;;  %v1758_v19 = vld [vmem:[%s3369_s13 + $0x28] sm:$0xff] }
 0x6a2   :  { %2439 = vmatprep.subr.bf16.mxu0 %v2438_v21  ;;  %v2486_v20 = vpack.c.bf16 %v1758_v19, %v1757_v16  ;;  %v1759_v21 = vld [vmem:[%s3369_s13 + $0x30] sm:$0xff] }
 0x6a3   :  { %2413 = vmatpush3.bf16.msra.mxu1 %v2412_v26  ;;  %v2489_v25 = vpack.c.bf16 %v1760_v23, %v1759_v21  ;;  %v1761_v26 = vld [vmem:[%s3369_s13 + $0x40] sm:$0xff] }
 0x6a4   :  { %2446 = vmatprep.subr.bf16.mxu1 %v2707_v0  ;;  %v2492_v28 = vpack.c.bf16 %v1762_v27, %v1761_v26 }
 0x6a5   :  { %2441 = vmatpush3.bf16.msra.mxu0 %v2440_v18  ;;  %v1766_v18 = vld [vmem:[%s3369_s13 + $0x68] sm:$0xff] }
 0x6a6   :  { %1607 = vmatmul.mubr.f32.vlgmr.msra.gmra.mrb[12].mxu1 %v1235_v37  ;;  %2443 = vmatprep.subr.bf16.mxu0 %v2442_v58  ;;  %v2498_v22 = vpack.c.bf16 %v1766_v18, %v1765_v32  ;;  %v1767_v58 = vld [vmem:[%s3369_s13 + $0x70] sm:$0xff]  ;;  %s2710_s13 = smov [#allocation16]  }
 0x6a7   :  { %2448 = vmatpush1.bf16.msra.mxu1 %v2447_v36  ;;  %1942 = vmatprep.mubr.msk.f32.mxu1 %vm1398_vm5, %v1240_v40  ;;  %v2501_v35 = vpack.c.bf16 %v1768_v33, %v1767_v58  ;;  %s1853_s7 = sshll.u32 %s2710_s13, 4  ;;  %s1854_s7 = int_to_ptr.vmem [resolvable:$true] %s1853_s7 }
 0x6a8   :  { %2449 = vmatprep.subr.bf16.mxu1 %v2707_v0  ;;  %s2662_s16 = scalar_lea.vmem %s1854_s7, 32  ;;  %p2667_p12 = scmp.lt.s32.totalorder %s1854_s7, %s1854_s7 }
 0x6a9   :  { %2445 = vmatpush3.bf16.msra.mxu0 %v2444_v41  ;;  %p2663_p11 = scmp.ne.s32.totalorder %s1854_s7, %s2662_s16  ;;  %p2668_p13 = scmp.lt.s32.totalorder %s2662_s16, %s2662_s16 }
 0x6aa   :  { %2479 = vmatprep.subr.bf16.mxu0 %v2707_v0 }
 0x6ab   :  { %2451 = vmatpush1.bf16.msra.mxu1 %v2450_v17  ;;  %p2669_p0 = por %p2668_p13, %p2667_p12 }
 0x6ac   :  { %1677 = vmatmul.mubr.f32.vlgmr.msra.gmra.mrb[14].mxu0 %v1237_v44  ;;  %2452 = vmatprep.subr.bf16.mxu1 %v2707_v0 }
 0x6ad   :  { %2253 = vmatprep.mubr.msk.f32.mxu0 %vm2708_vm0, %v2709_v1  ;;  %v2465_v1 = vpack.c.bf16 %v1382_v55, %v1381_v54  ;;  %2481 = vmatpush3.bf16.msra.mxu0 %v2480_v14  ;;  %p2670_p1 = pnand %p2669_p0, %p2663_p11 }
 0x6ae   :  { %2482 = vmatprep.subr.bf16.mxu0 %v2707_v0 }
 0x6af   :  { %2454 = vmatpush1.bf16.msra.mxu1 %v2453_v45 }
 0x6b0   :  { %2455 = vmatprep.subr.bf16.mxu1 %v2707_v0 }
 0x6b1   :  { %2484 = vmatpush3.bf16.msra.mxu0 %v2483_v15 }
 0x6b2   :  { %2485 = vmatprep.subr.bf16.mxu0 %v2707_v0 }
 0x6b3   :  { %2457 = vmatpush1.bf16.msra.mxu1 %v2456_v47 }
 0x6b4   :  { %2458 = vmatprep.subr.bf16.mxu1 %v2707_v0 }
 0x6b5   :  { %2487 = vmatpush3.bf16.msra.mxu0 %v2486_v20 }
 0x6b6   :  { %2488 = vmatprep.subr.bf16.mxu0 %v2707_v0 }
 0x6b7   :  { %2460 = vmatpush1.bf16.msra.mxu1 %v2459_v50 }
 0x6b8   :  { %2461 = vmatprep.subr.bf16.mxu1 %v2707_v0 }
 0x6b9   :  { %2490 = vmatpush3.bf16.msra.mxu0 %v2489_v25 }
 0x6ba   :  { %2491 = vmatprep.subr.bf16.mxu0 %v2707_v0 }
 0x6bb   :  { %2463 = vmatpush1.bf16.msra.mxu1 %v2462_v53  ;;  %v1943_v53 = vld [vmem:[#allocation14] ss:$0 sm:$0xff] }
 0x6bc   :  { %2464 = vmatprep.subr.bf16.mxu1 %v2707_v0 }
 0x6bd   :  { %2493 = vmatpush3.bf16.msra.mxu0 %v2492_v28 }
 0x6be   :  { %2494 = vmatprep.subr.bf16.mxu0 %v2707_v0 }
 0x6bf   :  { %2466 = vmatpush1.bf16.msra.mxu1 %v2465_v1 }
 0x6c0   :  { %2467 = vmatprep.subr.bf16.mxu1 %v2707_v0 }
 0x6c1   :  { %2496 = vmatpush3.bf16.msra.mxu0 %v2495_v31 }
 0x6c2   :  { %2497 = vmatprep.subr.bf16.mxu0 %v2707_v0 }
 0x6c3   :  { %2469 = vmatpush1.bf16.msra.mxu1 %v2468_v59 }
 0x6c4   :  { %2470 = vmatprep.subr.bf16.mxu1 %v2707_v0 }
 0x6c5   :  { %2499 = vmatpush3.bf16.msra.mxu0 %v2498_v22 }
 0x6c6   :  { %2500 = vmatprep.subr.bf16.mxu0 %v2707_v0 }
 0x6c7   :  { %2472 = vmatpush1.bf16.msra.mxu1 %v2471_v63 }
 0x6c8   :  { %2473 = vmatprep.subr.bf16.mxu1 %v2707_v0 }
 0x6c9   :  { %2502 = vmatpush3.bf16.msra.mxu0 %v2501_v35 }
 0x6cb   :  { %2475 = vmatpush1.bf16.msra.mxu1 %v2474_v5 }
 0x6cc   :  { %2476 = vmatprep.subr.bf16.mxu1 %v2707_v0 }
 0x6cf   :  { %2478 = vmatpush1.bf16.msra.mxu1 %v2477_v10 }
 0x6d2   :  { %1747 = vmatmul.mubr.f32.vlgmr.msra.gmra.mrb[14].mxu1 %v1239_v12 }
 0x759   :  { %v2014_v36 = vpop.f32.mrb[10].mxu1 }
 0x75a   :  { %v2015_v37 = vpop.f32.mrb[11].mxu1 }
 0x75b   :  { %v2016_v9 = vadd.f32 %v2015_v37, %v2014_v36 }
 0x75d   :  { %v1469_v38 = vadd.f32 %v2016_v9, %v1941_v39 }
 0x75f   :  { %v2049_v40 = vpop.f32.mrb[12].mxu0 }
 0x760   :  { %v2050_v41 = vpop.f32.mrb[13].mxu0 }
 0x761   :  { %v2051_v17 = vadd.f32 %v2050_v41, %v2049_v40 }
 0x763   :  { %v1539_v42 = vadd.f32 %v2051_v17, %v1469_v38 }
 0x779   :  { %v2084_v0 = vpop.f32.mrb[12].mxu1 }
 0x77a   :  { %v2085_v43 = vpop.f32.mrb[13].mxu1 }
 0x77b   :  { %v2086_v44 = vadd.f32 %v2085_v43, %v2084_v0 }
 0x77d   :  { %v1609_v45 = vadd.f32 %v2086_v44, %v1539_v42 }
 0x77f   :  { %v2119_v46 = vpop.f32.mrb[14].mxu0 }
 0x780   :  { %v2120_v24 = vpop.f32.mrb[15].mxu0 }
 0x781   :  { %v2121_v47 = vadd.f32 %v2120_v24, %v2119_v46 }
 0x783   :  { %v1679_v48 = vadd.f32 %v2121_v47, %v1609_v45 }
 0x7a5   :  { %v1748_v49 = vpop.f32.mrb[14].mxu1 }
 0x7a6   :  { %v1749_v50 = vadd.f32 %v1748_v49, %v1679_v48  ;;  %v1750_v51 = vpop.f32.mrb[15].mxu1 }
 0x7a8   :  { %v1752_v52 = vmax.f32 %v1749_v50, 0.0 }
 0x7aa   :  { %2254 = vmatmul.mubr.f32.vlgmr.msra.gmra.mrb[16].mxu0 %v1752_v52 }
 0x87d   :  { %v1842_v54 = vpop.f32.mrb[16].mxu0 }
 0x87e   :  { %v1843_v55 = vadd.f32 %v1943_v53, %v1842_v54  ;;  %v2255_v1 = vpop.f32.mrb[17].mxu0 }
 0x880   :  { %1846 = vst [vmem:[#allocation16] sm:$0x3] %v1843_v55 }
 0x881   :  { %2673 = shalt.err (!%p2670_p1)
}
 0x882   :  { %s3377_s5 = sld [smem:[#allocation23_spill]] }
 0x888   :  { %s2674_s4 = scalar_lea.hbm %s3377_s5, 32 }
 0x889   :  { %p2675_p2 = scmp.ne.s32.totalorder %s3377_s5, %s2674_s4  ;;  %p2678_p3 = scmp.lt.u32.totalorder %s2674_s4, %s3377_s5 }
 0x88b   :  { %p2680_p4 = pnand %p2678_p3, %p2675_p2 }
 0x88d   :  { %2683 = shalt.err (!%p2680_p4)
}
 0x88e   :  { %1856 = dma.vmem_to_hbm [thread:$0]  %s1854_s7, 32, %s3377_s5, [#allocation7]  }
 0x88f   :  { %2694 = dma.done.wait [#allocation7], 32  }
 0x890   :  { %2695 = vsyncadd [#allocation7], 4294967264 }
 0x891   :  { %1860 = vsyncpa [#allocation6], 1 }
 0x892   :  { %1861 = vsyncpa [#allocation9], 1 }
 0x893   :  { %1862 = vsyncpa [#allocation12], 1 }
 0x894   :  { %1863 = vsyncpa [#allocation15], 1 }
 0x895   :  { %1864 = vsyncpa [#allocation7], 1 }

</bundles_post_ra>
